<compile_context>
chip_gen: v6e
topology: v6e:2x2x1
jax: 0.10.0
libtpu: 0.0.40
codegen_flags: <defaults>
</compile_context>

<pallas_src>
import numpy as np

import jax
import jax.numpy as jnp
from jax.experimental import pallas as pl
from jax.experimental.pallas import tpu as pltpu


LANES = 128     # lane-dense column width for every stored activation
TOP_PAD = 8     # zero rows above the first image (supplies the padding=1 top row)
IMG_H = 28


# ----------------------------------------------------------------------------
# The single fused Pallas kernel
# ----------------------------------------------------------------------------

def _encoder_kernel(a0_ref,
                    m1_ref, f1_ref, f1t_ref, g1_ref, be1_ref,
                    m2_ref, f2_ref, f2t_ref, g2_ref, be2_ref,
                    m3_ref, b3_ref, wl1_ref, bl1_ref, wl2_ref, bl2_ref,
                    o_ref, y1s_ref, y2s_ref):
    f32 = jnp.float32
    n = o_ref.shape[0]

    def conv_taps(src_ref, rows_out):
        # Stride-2 conv, padding=1: tap kh needs per-image input row (2*oh + kh - 1).
        # Images are stored 2*(rows_out/n) rows apart underneath TOP_PAD zero rows,
        # so ONE strided sublane read per tap fetches every (image, oh) pair at once.
        taps = [src_ref[pl.ds(TOP_PAD - 1 + kh, rows_out, stride=2), :]
                for kh in range(3)]
        return jnp.concatenate(taps, axis=1)                       # (rows_out, 3*128)

    def bn_relu(z, keep, f_ref, ft_ref, g_ref, b_ref, count):
        # Training-mode BatchNorm (batch statistics) + ReLU on a (R, W*C)-layout
        # activation.  `keep` masks the phantom rows introduced by the power-of-2
        # per-image row pitch so they do not pollute the statistics.
        z = jnp.where(keep, z, 0.0)
        r = z.shape[0]
        # One fused statistics matmul: columns folded per-channel for [z ; z*z].
        st = jnp.dot(jnp.concatenate([z, z * z], axis=0), f_ref[...],
                     preferred_element_type=f32)                   # (2R, C)
        s = jnp.sum(st[:r], axis=0, keepdims=True)                 # (1, C) sum
        sq = jnp.sum(st[r:], axis=0, keepdims=True)                # (1, C) sum of sq
        inv = 1.0 / count
        mean = s * inv
        var = jnp.maximum(sq * inv - mean * mean, 0.0)
        scale = g_ref[...] * jax.lax.rsqrt(var + 1e-5)             # (1, C)
        shift = b_ref[...] - mean * scale                          # (1, C)
        # Single (2,C)@(C,W*C) broadcast matmul; rows broadcast over sublanes below.
        ssr = jnp.dot(jnp.concatenate([scale, shift], axis=0), ft_ref[...],
                      preferred_element_type=f32)                  # (2, W*C)
        scale_row = ssr[0:1, :]
        shift_row = ssr[1:2, :]
        return jnp.where(keep, jnp.maximum(z * scale_row + shift_row, 0.0), 0.0)

    # --- Conv2d(1,8,3,s=2,p=1) + BN(8) + ReLU  (conv bias cancels in batch BN) ---
    z1 = jnp.dot(conv_taps(a0_ref, n * 16), m1_ref[...],
                 preferred_element_type=f32)                       # (N*16, 128)
    keep1 = (jax.lax.broadcasted_iota(jnp.int32, z1.shape, 0) & 15) < 14
    y1 = bn_relu(z1, keep1, f1_ref, f1t_ref, g1_ref, be1_ref, float(n * 14 * 14))
    y1s_ref[pl.ds(0, TOP_PAD), :] = jnp.zeros((TOP_PAD, LANES), f32)
    y1s_ref[pl.ds(TOP_PAD, n * 16), :] = y1

    # --- Conv2d(8,16,3,s=2,p=1) + BN(16) + ReLU ----------------------------------
    z2 = jnp.dot(conv_taps(y1s_ref, n * 8), m2_ref[...],
                 preferred_element_type=f32)                       # (N*8, 128)
    keep2 = (jax.lax.broadcasted_iota(jnp.int32, z2.shape, 0) & 7) < 7
    y2 = bn_relu(z2, keep2, f2_ref, f2t_ref, g2_ref, be2_ref, float(n * 7 * 7))
    y2s_ref[...] = y2

    # --- Conv2d(16,32,3,s=2,p=0) + bias + ReLU, emitted per-image flattened ------
    # Gather the 7 valid rows of every image with tile-aligned stride-8 reads and
    # contract (h, w, c_in) in ONE matmul; output columns ordered (oh, ow, co).
    cs3 = jnp.concatenate([y2s_ref[pl.ds(j, n, stride=8), :] for j in range(7)],
                          axis=1)                                  # (N, 7*128)
    y3 = jnp.maximum(jnp.dot(cs3, m3_ref[...], preferred_element_type=f32)
                     + b3_ref[...], 0.0)                           # (N, 288)

    # --- Linear(288,128) + ReLU + Linear(128, encoded_dim) ------------------------
    h = jnp.maximum(jnp.dot(y3, wl1_ref[...], preferred_element_type=f32)
                    + bl1_ref[...], 0.0)                           # (N, 128)
    o_ref[...] = jnp.dot(h, wl2_ref[...], preferred_element_type=f32) + bl2_ref[...]


# ----------------------------------------------------------------------------
# One-time (init) weight packing: fold 3x3 stride-2 convs into dense matrices
# over the lane-dense (w, c_in) column layout.  Nothing depends on batch size.
# ----------------------------------------------------------------------------

def _fold_conv_weight(w_oihw, w_in, w_out, pad, in_cols, out_cols):
    # Rows: kh*in_cols + w*C_in + ci ; columns: ow*C_out + co.
    co_n, ci_n = w_oihw.shape[0], w_oihw.shape[1]
    m = np.zeros((3 * in_cols, out_cols), np.float32)
    for kh in range(3):
        for ow in range(w_out):
            for kw in range(3):
                w = 2 * ow + kw - pad
                if 0 <= w < w_in:
                    m[kh * in_cols + w * ci_n: kh * in_cols + (w + 1) * ci_n,
                      ow * co_n: (ow + 1) * co_n] = w_oihw[:, :, kh, kw].T
    return m


def _fold_conv3_and_flatten(w3, in_cols):
    # Full 3x3 stride-2 VALID conv (16->32) over a per-image flattened (h, w, ci)
    # input.  Rows: h*in_cols + w*16 + ci ; columns: oh*96 + ow*32 + co.
    m = np.zeros((7 * in_cols, 288), np.float32)
    for oh in range(3):
        for kh in range(3):
            j = 2 * oh + kh
            for ow in range(3):
                for kw in range(3):
                    w = 2 * ow + kw
                    m[j * in_cols + w * 16: j * in_cols + (w + 1) * 16,
                      oh * 96 + ow * 32: oh * 96 + (ow + 1) * 32] = w3[:, :, kh, kw].T
    return m


def _bn_fold(c, w):
    f = np.zeros((LANES, c), np.float32)
    f[:w * c] = np.tile(np.eye(c, dtype=np.float32), (w, 1))
    return f


def pack_params(params):
    g = lambda k: np.asarray(params[k], np.float32)
    w1, w2, w3 = g("w1"), g("w2"), g("w3")
    wl1, wl2 = g("wl1"), g("wl2")
    e = wl2.shape[0]

    f1 = _bn_fold(8, 14)
    f2 = _bn_fold(16, 7)

    # Linear-1 weight re-indexed to the kernel's (oh, ow, co) flatten order
    # (PyTorch flattens channel-major: co*9 + oh*3 + ow).
    wl1p = wl1.reshape(128, 32, 3, 3).transpose(2, 3, 1, 0).reshape(288, 128)

    packed = {
        "m1": _fold_conv_weight(w1, 28, 14, 1, LANES, LANES),
        "f1": f1, "f1t": np.ascontiguousarray(f1.T),
        "g1": g("g1").reshape(1, 8), "be1": g("be1").reshape(1, 8),
        "m2": _fold_conv_weight(w2, 14, 7, 1, LANES, LANES),
        "f2": f2, "f2t": np.ascontiguousarray(f2.T),
        "g2": g("g2").reshape(1, 16), "be2": g("be2").reshape(1, 16),
        "m3": _fold_conv3_and_flatten(w3, LANES),
        "b3": np.tile(g("b3"), 9).reshape(1, 288),
        "wl1": np.ascontiguousarray(wl1p),
        "bl1": g("bl1").reshape(1, 128),
        "wl2": np.ascontiguousarray(wl2.T),
        "bl2": g("bl2").reshape(1, e),
    }
    return {k: jnp.asarray(v) for k, v in packed.items()}


_ARG_ORDER = ("m1", "f1", "f1t", "g1", "be1",
              "m2", "f2", "f2t", "g2", "be2",
              "m3", "b3", "wl1", "bl1", "wl2", "bl2")


@jax.jit
def encoder_forward(x, packed):
    n = x.shape[0]
    e = packed["bl2"].shape[1]
    # NCHW (C=1) -> (TOP_PAD + N*32, 128): each image padded to a 32-row x 128-lane
    # slab of zeros around the 28x28 data.  The zero rows provide the conv
    # "same"-padding for free and make every in-kernel gather a strided read.
    a0 = x.reshape(n, IMG_H, IMG_H)
    a0 = jnp.pad(a0, ((0, 0), (0, 32 - IMG_H), (0, LANES - IMG_H)))
    a0 = jnp.pad(a0.reshape(n * 32, LANES), ((TOP_PAD, 0), (0, 0)))

    vmem = pl.BlockSpec(memory_space=pltpu.MemorySpace.VMEM)
    args = [a0] + [packed[k] for k in _ARG_ORDER]
    return pl.pallas_call(
        _encoder_kernel,
        out_shape=jax.ShapeDtypeStruct((n, e), jnp.float32),
        in_specs=[vmem] * len(args),
        out_specs=vmem,
        scratch_shapes=[
            pltpu.VMEM((TOP_PAD + n * 16, LANES), jnp.float32),  # y1 (14x14x8, padded)
            pltpu.VMEM((n * 8, LANES), jnp.float32),             # y2 (7x7x16, padded)
        ],
    )(*args)


# ----------------------------------------------------------------------------
# Pure-JAX reference (training-mode BN, conv biases included) for checking
# ----------------------------------------------------------------------------

def reference_forward(x, params):
    def conv(x, w, b, stride, pad):
        y = jax.lax.conv_general_dilated(
            x, w, (stride, stride), [(pad, pad), (pad, pad)],
            dimension_numbers=("NCHW", "OIHW", "NCHW"))
        return y + b[None, :, None, None]

    def bn(y, g, be):
        mean = y.mean(axis=(0, 2, 3), keepdims=True)
        var = ((y - mean) ** 2).mean(axis=(0, 2, 3), keepdims=True)
        return ((y - mean) * jax.lax.rsqrt(var + 1e-5)
                * g[None, :, None, None] + be[None, :, None, None])

    y = jax.nn.relu(bn(conv(x, params["w1"], params["b1"], 2, 1),
                       params["g1"], params["be1"]))
    y = jax.nn.relu(bn(conv(y, params["w2"], params["b2"], 2, 1),
                       params["g2"], params["be2"]))
    y = jax.nn.relu(conv(y, params["w3"], params["b3"], 2, 0))
    y = y.reshape(x.shape[0], -1)
    y = jax.nn.relu(y @ params["wl1"].T + params["bl1"])
    return y @ params["wl2"].T + params["bl2"]


# ----------------------------------------------------------------------------
# Deterministic parameter init + driver
# ----------------------------------------------------------------------------

def init_params(key, encoded_dim):
    ks = jax.random.split(key, 10)
    f32 = jnp.float32
    return {
        "w1": jax.random.normal(ks[0], (8, 1, 3, 3), f32) * 0.1,
        "b1": jax.random.normal(ks[1], (8,), f32) * 0.1,
        "g1": jnp.ones((8,), f32), "be1": jnp.zeros((8,), f32),
        "w2": jax.random.normal(ks[2], (16, 8, 3, 3), f32) * 0.1,
        "b2": jax.random.normal(ks[3], (16,), f32) * 0.1,
        "g2": jnp.ones((16,), f32), "be2": jnp.zeros((16,), f32),
        "w3": jax.random.normal(ks[4], (32, 16, 3, 3), f32) * 0.1,
        "b3": jax.random.normal(ks[5], (32,), f32) * 0.1,
        "wl1": jax.random.normal(ks[6], (128, 3 * 3 * 32), f32) * 0.05,
        "bl1": jax.random.normal(ks[7], (128,), f32) * 0.05,
        "wl2": jax.random.normal(ks[8], (encoded_dim, 128), f32) * 0.05,
        "bl2": jax.random.normal(ks[9], (encoded_dim,), f32) * 0.05,
    }


if __name__ == "__main__":
    encoded_dim = 16
    key = jax.random.PRNGKey(0)
    kx, kp = jax.random.split(key)

    # MNIST-shaped input, small batch.
    x = jax.random.normal(kx, (4, 1, 28, 28), jnp.float32)
    params = init_params(kp, encoded_dim)

    packed = pack_params(params)               # one-time, batch-size independent
    out = encoder_forward(x, packed)
    out = jax.block_until_ready(out)

    ref = reference_forward(x, params)
    assert out.shape == (4, encoded_dim), out.shape
    err = float(jnp.max(jnp.abs(out - ref)))
    assert jnp.allclose(out, ref, atol=2e-3, rtol=2e-3), err

    print("KERNEL_OK")
</pallas_src>

<mosaic_0001>
module attributes {stable_mosaic.version = 11 : i64} {
  func.func @_encoder_kernel(%arg0: memref<136x128xf32, #tpu.memory_space<vmem>>, %arg1: memref<384x128xf32, #tpu.memory_space<vmem>>, %arg2: memref<128x8xf32, #tpu.memory_space<vmem>>, %arg3: memref<8x128xf32, #tpu.memory_space<vmem>>, %arg4: memref<1x8xf32, #tpu.memory_space<vmem>>, %arg5: memref<1x8xf32, #tpu.memory_space<vmem>>, %arg6: memref<384x128xf32, #tpu.memory_space<vmem>>, %arg7: memref<128x16xf32, #tpu.memory_space<vmem>>, %arg8: memref<16x128xf32, #tpu.memory_space<vmem>>, %arg9: memref<1x16xf32, #tpu.memory_space<vmem>>, %arg10: memref<1x16xf32, #tpu.memory_space<vmem>>, %arg11: memref<896x288xf32, #tpu.memory_space<vmem>>, %arg12: memref<1x288xf32, #tpu.memory_space<vmem>>, %arg13: memref<288x128xf32, #tpu.memory_space<vmem>>, %arg14: memref<1x128xf32, #tpu.memory_space<vmem>>, %arg15: memref<128x16xf32, #tpu.memory_space<vmem>>, %arg16: memref<1x16xf32, #tpu.memory_space<vmem>>, %arg17: memref<4x16xf32, #tpu.memory_space<vmem>>, %arg18: memref<72x128xf32, #tpu.memory_space<vmem>>, %arg19: memref<32x128xf32, #tpu.memory_space<vmem>>) attributes {dimension_semantics = [], scalar_prefetch = 0 : i64, scratch_operands = 2 : i64, tpu.core_type = #tpu.core_type<tc>} {
    %c7 = arith.constant 7 : index
    %c0 = arith.constant 0 : index
    %0 = tpu.strided_load %arg0[%c7, %c0] {strides = array<i32: 2, 1>} : memref<136x128xf32, #tpu.memory_space<vmem>>, vector<64x128xf32>
    %c8 = arith.constant 8 : index
    %c0_0 = arith.constant 0 : index
    %1 = tpu.strided_load %arg0[%c8, %c0_0] {strides = array<i32: 2, 1>} : memref<136x128xf32, #tpu.memory_space<vmem>>, vector<64x128xf32>
    %c9 = arith.constant 9 : index
    %c0_1 = arith.constant 0 : index
    %2 = tpu.strided_load %arg0[%c9, %c0_1] {strides = array<i32: 2, 1>} : memref<136x128xf32, #tpu.memory_space<vmem>>, vector<64x128xf32>
    %3 = tpu.concatenate %0, %1, %2 in 1 : vector<64x128xf32>, vector<64x128xf32>, vector<64x128xf32> -> vector<64x384xf32>
    %c0_2 = arith.constant 0 : index
    %c0_3 = arith.constant 0 : index
    %4 = vector.load %arg1[%c0_2, %c0_3] : memref<384x128xf32, #tpu.memory_space<vmem>>, vector<384x128xf32>
    %cst = arith.constant dense<0.000000e+00> : vector<64x128xf32>
    %5 = tpu.matmul %3, %4, %cst {dimension_numbers = #tpu.dot_dimension_numbers<[1], [0], [0], [1], [0, 0, 1, 1], [], []>} : vector<64x384xf32>, vector<384x128xf32>, vector<64x128xf32> -> vector<64x128xf32>
    %6 = tpu.iota {dimensions = array<i32: 0>} : vector<64x128xi32>
    %c15_i32 = arith.constant 15 : i32
    %7 = vector.broadcast %c15_i32 : i32 to vector<64x128xi32>
    %8 = arith.andi %6, %7 : vector<64x128xi32>
    %c14_i32 = arith.constant 14 : i32
    %9 = vector.broadcast %c14_i32 : i32 to vector<64x128xi32>
    %10 = arith.cmpi slt, %8, %9 : vector<64x128xi32>
    %cst_4 = arith.constant 0.000000e+00 : f32
    %11 = vector.broadcast %cst_4 : f32 to vector<64x128xf32>
    %12 = arith.select %10, %5, %11 : vector<64x128xi1>, vector<64x128xf32>
    %13 = arith.mulf %12, %12 : vector<64x128xf32>
    %14 = tpu.concatenate %12, %13 in 0 : vector<64x128xf32>, vector<64x128xf32> -> vector<128x128xf32>
    %c0_5 = arith.constant 0 : index
    %c0_6 = arith.constant 0 : index
    %15 = vector.load %arg2[%c0_5, %c0_6] : memref<128x8xf32, #tpu.memory_space<vmem>>, vector<128x8xf32>
    %cst_7 = arith.constant dense<0.000000e+00> : vector<128x8xf32>
    %16 = tpu.matmul %14, %15, %cst_7 {dimension_numbers = #tpu.dot_dimension_numbers<[1], [0], [0], [1], [0, 0, 1, 1], [], []>} : vector<128x128xf32>, vector<128x8xf32>, vector<128x8xf32> -> vector<128x8xf32>
    %17 = vector.extract_strided_slice %16 {offsets = [0, 0], sizes = [64, 8], strides = [1, 1]} : vector<128x8xf32> to vector<64x8xf32>
    %cst_8 = arith.constant dense<0.000000e+00> : vector<8xf32>
    %18 = vector.multi_reduction <add>, %17, %cst_8 [0] : vector<64x8xf32> to vector<8xf32>
    %19 = vector.shape_cast %18 : vector<8xf32> to vector<1x8xf32>
    %20 = vector.extract_strided_slice %16 {offsets = [64, 0], sizes = [64, 8], strides = [1, 1]} : vector<128x8xf32> to vector<64x8xf32>
    %cst_9 = arith.constant dense<0.000000e+00> : vector<8xf32>
    %21 = vector.multi_reduction <add>, %20, %cst_9 [0] : vector<64x8xf32> to vector<8xf32>
    %22 = vector.shape_cast %21 : vector<8xf32> to vector<1x8xf32>
    %cst_10 = arith.constant 0.00127551018 : f32
    %23 = vector.broadcast %cst_10 : f32 to vector<1x8xf32>
    %24 = arith.mulf %19, %23 : vector<1x8xf32>
    %cst_11 = arith.constant 0.00127551018 : f32
    %25 = vector.broadcast %cst_11 : f32 to vector<1x8xf32>
    %26 = arith.mulf %22, %25 : vector<1x8xf32>
    %27 = arith.mulf %24, %24 : vector<1x8xf32>
    %28 = arith.subf %26, %27 : vector<1x8xf32>
    %cst_12 = arith.constant 0.000000e+00 : f32
    %29 = vector.broadcast %cst_12 : f32 to vector<1x8xf32>
    %30 = arith.maximumf %28, %29 : vector<1x8xf32>
    %c0_13 = arith.constant 0 : index
    %c0_14 = arith.constant 0 : index
    %31 = vector.load %arg4[%c0_13, %c0_14] : memref<1x8xf32, #tpu.memory_space<vmem>>, vector<1x8xf32>
    %cst_15 = arith.constant 9.99999974E-6 : f32
    %32 = vector.broadcast %cst_15 : f32 to vector<1x8xf32>
    %33 = arith.addf %30, %32 : vector<1x8xf32>
    %34 = math.rsqrt %33 : vector<1x8xf32>
    %35 = arith.mulf %31, %34 : vector<1x8xf32>
    %c0_16 = arith.constant 0 : index
    %c0_17 = arith.constant 0 : index
    %36 = vector.load %arg5[%c0_16, %c0_17] : memref<1x8xf32, #tpu.memory_space<vmem>>, vector<1x8xf32>
    %37 = arith.mulf %24, %35 : vector<1x8xf32>
    %38 = arith.subf %36, %37 : vector<1x8xf32>
    %39 = tpu.concatenate %35, %38 in 0 : vector<1x8xf32>, vector<1x8xf32> -> vector<2x8xf32>
    %c0_18 = arith.constant 0 : index
    %c0_19 = arith.constant 0 : index
    %40 = vector.load %arg3[%c0_18, %c0_19] : memref<8x128xf32, #tpu.memory_space<vmem>>, vector<8x128xf32>
    %cst_20 = arith.constant dense<0.000000e+00> : vector<2x128xf32>
    %41 = tpu.matmul %39, %40, %cst_20 {dimension_numbers = #tpu.dot_dimension_numbers<[1], [0], [0], [1], [0, 0, 1, 1], [], []>} : vector<2x8xf32>, vector<8x128xf32>, vector<2x128xf32> -> vector<2x128xf32>
    %42 = vector.extract_strided_slice %41 {offsets = [0, 0], sizes = [1, 128], strides = [1, 1]} : vector<2x128xf32> to vector<1x128xf32>
    %43 = vector.extract_strided_slice %41 {offsets = [1, 0], sizes = [1, 128], strides = [1, 1]} : vector<2x128xf32> to vector<1x128xf32>
    %44 = vector.broadcast %42 : vector<1x128xf32> to vector<64x128xf32>
    %45 = arith.mulf %12, %44 : vector<64x128xf32>
    %46 = vector.broadcast %43 : vector<1x128xf32> to vector<64x128xf32>
    %47 = arith.addf %45, %46 : vector<64x128xf32>
    %cst_21 = arith.constant 0.000000e+00 : f32
    %48 = vector.broadcast %cst_21 : f32 to vector<64x128xf32>
    %49 = arith.maximumf %47, %48 : vector<64x128xf32>
    %cst_22 = arith.constant 0.000000e+00 : f32
    %50 = vector.broadcast %cst_22 : f32 to vector<64x128xf32>
    %51 = arith.select %10, %49, %50 : vector<64x128xi1>, vector<64x128xf32>
    %cst_23 = arith.constant 0.000000e+00 : f32
    %52 = vector.broadcast %cst_23 : f32 to vector<8x128xf32>
    %c0_24 = arith.constant 0 : index
    %c0_25 = arith.constant 0 : index
    %53 = vector.load %arg18[%c0_24, %c0_25] : memref<72x128xf32, #tpu.memory_space<vmem>>, vector<8x128xf32>
    tpu.vector_store %arg18[%c0_24, %c0_25], %52 {strides = array<i32>} : memref<72x128xf32, #tpu.memory_space<vmem>>, vector<8x128xf32>,
    %c8_26 = arith.constant 8 : index
    %c0_27 = arith.constant 0 : index
    %54 = vector.load %arg18[%c8_26, %c0_27] : memref<72x128xf32, #tpu.memory_space<vmem>>, vector<64x128xf32>
    tpu.vector_store %arg18[%c8_26, %c0_27], %51 {strides = array<i32>} : memref<72x128xf32, #tpu.memory_space<vmem>>, vector<64x128xf32>,
    %c7_28 = arith.constant 7 : index
    %c0_29 = arith.constant 0 : index
    %55 = tpu.strided_load %arg18[%c7_28, %c0_29] {strides = array<i32: 2, 1>} : memref<72x128xf32, #tpu.memory_space<vmem>>, vector<32x128xf32>
    %c8_30 = arith.constant 8 : index
    %c0_31 = arith.constant 0 : index
    %56 = tpu.strided_load %arg18[%c8_30, %c0_31] {strides = array<i32: 2, 1>} : memref<72x128xf32, #tpu.memory_space<vmem>>, vector<32x128xf32>
    %c9_32 = arith.constant 9 : index
    %c0_33 = arith.constant 0 : index
    %57 = tpu.strided_load %arg18[%c9_32, %c0_33] {strides = array<i32: 2, 1>} : memref<72x128xf32, #tpu.memory_space<vmem>>, vector<32x128xf32>
    %58 = tpu.concatenate %55, %56, %57 in 1 : vector<32x128xf32>, vector<32x128xf32>, vector<32x128xf32> -> vector<32x384xf32>
    %c0_34 = arith.constant 0 : index
    %c0_35 = arith.constant 0 : index
    %59 = vector.load %arg6[%c0_34, %c0_35] : memref<384x128xf32, #tpu.memory_space<vmem>>, vector<384x128xf32>
    %cst_36 = arith.constant dense<0.000000e+00> : vector<32x128xf32>
    %60 = tpu.matmul %58, %59, %cst_36 {dimension_numbers = #tpu.dot_dimension_numbers<[1], [0], [0], [1], [0, 0, 1, 1], [], []>} : vector<32x384xf32>, vector<384x128xf32>, vector<32x128xf32> -> vector<32x128xf32>
    %61 = tpu.iota {dimensions = array<i32: 0>} : vector<32x128xi32>
    %c7_i32 = arith.constant 7 : i32
    %62 = vector.broadcast %c7_i32 : i32 to vector<32x128xi32>
    %63 = arith.andi %61, %62 : vector<32x128xi32>
    %c7_i32_37 = arith.constant 7 : i32
    %64 = vector.broadcast %c7_i32_37 : i32 to vector<32x128xi32>
    %65 = arith.cmpi slt, %63, %64 : vector<32x128xi32>
    %cst_38 = arith.constant 0.000000e+00 : f32
    %66 = vector.broadcast %cst_38 : f32 to vector<32x128xf32>
    %67 = arith.select %65, %60, %66 : vector<32x128xi1>, vector<32x128xf32>
    %68 = arith.mulf %67, %67 : vector<32x128xf32>
    %69 = tpu.concatenate %67, %68 in 0 : vector<32x128xf32>, vector<32x128xf32> -> vector<64x128xf32>
    %c0_39 = arith.constant 0 : index
    %c0_40 = arith.constant 0 : index
    %70 = vector.load %arg7[%c0_39, %c0_40] : memref<128x16xf32, #tpu.memory_space<vmem>>, vector<128x16xf32>
    %cst_41 = arith.constant dense<0.000000e+00> : vector<64x16xf32>
    %71 = tpu.matmul %69, %70, %cst_41 {dimension_numbers = #tpu.dot_dimension_numbers<[1], [0], [0], [1], [0, 0, 1, 1], [], []>} : vector<64x128xf32>, vector<128x16xf32>, vector<64x16xf32> -> vector<64x16xf32>
    %72 = vector.extract_strided_slice %71 {offsets = [0, 0], sizes = [32, 16], strides = [1, 1]} : vector<64x16xf32> to vector<32x16xf32>
    %cst_42 = arith.constant dense<0.000000e+00> : vector<16xf32>
    %73 = vector.multi_reduction <add>, %72, %cst_42 [0] : vector<32x16xf32> to vector<16xf32>
    %74 = vector.shape_cast %73 : vector<16xf32> to vector<1x16xf32>
    %75 = vector.extract_strided_slice %71 {offsets = [32, 0], sizes = [32, 16], strides = [1, 1]} : vector<64x16xf32> to vector<32x16xf32>
    %cst_43 = arith.constant dense<0.000000e+00> : vector<16xf32>
    %76 = vector.multi_reduction <add>, %75, %cst_43 [0] : vector<32x16xf32> to vector<16xf32>
    %77 = vector.shape_cast %76 : vector<16xf32> to vector<1x16xf32>
    %cst_44 = arith.constant 0.00510204071 : f32
    %78 = vector.broadcast %cst_44 : f32 to vector<1x16xf32>
    %79 = arith.mulf %74, %78 : vector<1x16xf32>
    %cst_45 = arith.constant 0.00510204071 : f32
    %80 = vector.broadcast %cst_45 : f32 to vector<1x16xf32>
    %81 = arith.mulf %77, %80 : vector<1x16xf32>
    %82 = arith.mulf %79, %79 : vector<1x16xf32>
    %83 = arith.subf %81, %82 : vector<1x16xf32>
    %cst_46 = arith.constant 0.000000e+00 : f32
    %84 = vector.broadcast %cst_46 : f32 to vector<1x16xf32>
    %85 = arith.maximumf %83, %84 : vector<1x16xf32>
    %c0_47 = arith.constant 0 : index
    %c0_48 = arith.constant 0 : index
    %86 = vector.load %arg9[%c0_47, %c0_48] : memref<1x16xf32, #tpu.memory_space<vmem>>, vector<1x16xf32>
    %cst_49 = arith.constant 9.99999974E-6 : f32
    %87 = vector.broadcast %cst_49 : f32 to vector<1x16xf32>
    %88 = arith.addf %85, %87 : vector<1x16xf32>
    %89 = math.rsqrt %88 : vector<1x16xf32>
    %90 = arith.mulf %86, %89 : vector<1x16xf32>
    %c0_50 = arith.constant 0 : index
    %c0_51 = arith.constant 0 : index
    %91 = vector.load %arg10[%c0_50, %c0_51] : memref<1x16xf32, #tpu.memory_space<vmem>>, vector<1x16xf32>
    %92 = arith.mulf %79, %90 : vector<1x16xf32>
    %93 = arith.subf %91, %92 : vector<1x16xf32>
    %94 = tpu.concatenate %90, %93 in 0 : vector<1x16xf32>, vector<1x16xf32> -> vector<2x16xf32>
    %c0_52 = arith.constant 0 : index
    %c0_53 = arith.constant 0 : index
    %95 = vector.load %arg8[%c0_52, %c0_53] : memref<16x128xf32, #tpu.memory_space<vmem>>, vector<16x128xf32>
    %cst_54 = arith.constant dense<0.000000e+00> : vector<2x128xf32>
    %96 = tpu.matmul %94, %95, %cst_54 {dimension_numbers = #tpu.dot_dimension_numbers<[1], [0], [0], [1], [0, 0, 1, 1], [], []>} : vector<2x16xf32>, vector<16x128xf32>, vector<2x128xf32> -> vector<2x128xf32>
    %97 = vector.extract_strided_slice %96 {offsets = [0, 0], sizes = [1, 128], strides = [1, 1]} : vector<2x128xf32> to vector<1x128xf32>
    %98 = vector.extract_strided_slice %96 {offsets = [1, 0], sizes = [1, 128], strides = [1, 1]} : vector<2x128xf32> to vector<1x128xf32>
    %99 = vector.broadcast %97 : vector<1x128xf32> to vector<32x128xf32>
    %100 = arith.mulf %67, %99 : vector<32x128xf32>
    %101 = vector.broadcast %98 : vector<1x128xf32> to vector<32x128xf32>
    %102 = arith.addf %100, %101 : vector<32x128xf32>
    %cst_55 = arith.constant 0.000000e+00 : f32
    %103 = vector.broadcast %cst_55 : f32 to vector<32x128xf32>
    %104 = arith.maximumf %102, %103 : vector<32x128xf32>
    %cst_56 = arith.constant 0.000000e+00 : f32
    %105 = vector.broadcast %cst_56 : f32 to vector<32x128xf32>
    %106 = arith.select %65, %104, %105 : vector<32x128xi1>, vector<32x128xf32>
    %c0_57 = arith.constant 0 : index
    %c0_58 = arith.constant 0 : index
    %107 = vector.load %arg19[%c0_57, %c0_58] : memref<32x128xf32, #tpu.memory_space<vmem>>, vector<32x128xf32>
    tpu.vector_store %arg19[%c0_57, %c0_58], %106 {strides = array<i32>} : memref<32x128xf32, #tpu.memory_space<vmem>>, vector<32x128xf32>,
    %c0_59 = arith.constant 0 : index
    %c0_60 = arith.constant 0 : index
    %108 = tpu.strided_load %arg19[%c0_59, %c0_60] {strides = array<i32: 8, 1>} : memref<32x128xf32, #tpu.memory_space<vmem>>, vector<4x128xf32>
    %c1 = arith.constant 1 : index
    %c0_61 = arith.constant 0 : index
    %109 = tpu.strided_load %arg19[%c1, %c0_61] {strides = array<i32: 8, 1>} : memref<32x128xf32, #tpu.memory_space<vmem>>, vector<4x128xf32>
    %c2 = arith.constant 2 : index
    %c0_62 = arith.constant 0 : index
    %110 = tpu.strided_load %arg19[%c2, %c0_62] {strides = array<i32: 8, 1>} : memref<32x128xf32, #tpu.memory_space<vmem>>, vector<4x128xf32>
    %c3 = arith.constant 3 : index
    %c0_63 = arith.constant 0 : index
    %111 = tpu.strided_load %arg19[%c3, %c0_63] {strides = array<i32: 8, 1>} : memref<32x128xf32, #tpu.memory_space<vmem>>, vector<4x128xf32>
    %c4 = arith.constant 4 : index
    %c0_64 = arith.constant 0 : index
    %112 = tpu.strided_load %arg19[%c4, %c0_64] {strides = array<i32: 8, 1>} : memref<32x128xf32, #tpu.memory_space<vmem>>, vector<4x128xf32>
    %c5 = arith.constant 5 : index
    %c0_65 = arith.constant 0 : index
    %113 = tpu.strided_load %arg19[%c5, %c0_65] {strides = array<i32: 8, 1>} : memref<32x128xf32, #tpu.memory_space<vmem>>, vector<4x128xf32>
    %c6 = arith.constant 6 : index
    %c0_66 = arith.constant 0 : index
    %114 = tpu.strided_load %arg19[%c6, %c0_66] {strides = array<i32: 8, 1>} : memref<32x128xf32, #tpu.memory_space<vmem>>, vector<4x128xf32>
    %115 = tpu.concatenate %108, %109, %110, %111, %112, %113, %114 in 1 : vector<4x128xf32>, vector<4x128xf32>, vector<4x128xf32>, vector<4x128xf32>, vector<4x128xf32>, vector<4x128xf32>, vector<4x128xf32> -> vector<4x896xf32>
    %c0_67 = arith.constant 0 : index
    %c0_68 = arith.constant 0 : index
    %116 = vector.load %arg11[%c0_67, %c0_68] : memref<896x288xf32, #tpu.memory_space<vmem>>, vector<896x288xf32>
    %cst_69 = arith.constant dense<0.000000e+00> : vector<4x288xf32>
    %117 = tpu.matmul %115, %116, %cst_69 {dimension_numbers = #tpu.dot_dimension_numbers<[1], [0], [0], [1], [0, 0, 1, 1], [], []>} : vector<4x896xf32>, vector<896x288xf32>, vector<4x288xf32> -> vector<4x288xf32>
    %c0_70 = arith.constant 0 : index
    %c0_71 = arith.constant 0 : index
    %118 = vector.load %arg12[%c0_70, %c0_71] : memref<1x288xf32, #tpu.memory_space<vmem>>, vector<1x288xf32>
    %119 = vector.broadcast %118 : vector<1x288xf32> to vector<4x288xf32>
    %120 = arith.addf %117, %119 : vector<4x288xf32>
    %cst_72 = arith.constant 0.000000e+00 : f32
    %121 = vector.broadcast %cst_72 : f32 to vector<4x288xf32>
    %122 = arith.maximumf %120, %121 : vector<4x288xf32>
    %c0_73 = arith.constant 0 : index
    %c0_74 = arith.constant 0 : index
    %123 = vector.load %arg13[%c0_73, %c0_74] : memref<288x128xf32, #tpu.memory_space<vmem>>, vector<288x128xf32>
    %cst_75 = arith.constant dense<0.000000e+00> : vector<4x128xf32>
    %124 = tpu.matmul %122, %123, %cst_75 {dimension_numbers = #tpu.dot_dimension_numbers<[1], [0], [0], [1], [0, 0, 1, 1], [], []>} : vector<4x288xf32>, vector<288x128xf32>, vector<4x128xf32> -> vector<4x128xf32>
    %c0_76 = arith.constant 0 : index
    %c0_77 = arith.constant 0 : index
    %125 = vector.load %arg14[%c0_76, %c0_77] : memref<1x128xf32, #tpu.memory_space<vmem>>, vector<1x128xf32>
    %126 = vector.broadcast %125 : vector<1x128xf32> to vector<4x128xf32>
    %127 = arith.addf %124, %126 : vector<4x128xf32>
    %cst_78 = arith.constant 0.000000e+00 : f32
    %128 = vector.broadcast %cst_78 : f32 to vector<4x128xf32>
    %129 = arith.maximumf %127, %128 : vector<4x128xf32>
    %c0_79 = arith.constant 0 : index
    %c0_80 = arith.constant 0 : index
    %130 = vector.load %arg15[%c0_79, %c0_80] : memref<128x16xf32, #tpu.memory_space<vmem>>, vector<128x16xf32>
    %cst_81 = arith.constant dense<0.000000e+00> : vector<4x16xf32>
    %131 = tpu.matmul %129, %130, %cst_81 {dimension_numbers = #tpu.dot_dimension_numbers<[1], [0], [0], [1], [0, 0, 1, 1], [], []>} : vector<4x128xf32>, vector<128x16xf32>, vector<4x16xf32> -> vector<4x16xf32>
    %c0_82 = arith.constant 0 : index
    %c0_83 = arith.constant 0 : index
    %132 = vector.load %arg16[%c0_82, %c0_83] : memref<1x16xf32, #tpu.memory_space<vmem>>, vector<1x16xf32>
    %133 = vector.broadcast %132 : vector<1x16xf32> to vector<4x16xf32>
    %134 = arith.addf %131, %133 : vector<4x16xf32>
    %c0_84 = arith.constant 0 : index
    %c0_85 = arith.constant 0 : index
    %135 = vector.load %arg17[%c0_84, %c0_85] : memref<4x16xf32, #tpu.memory_space<vmem>>, vector<4x16xf32>
    tpu.vector_store %arg17[%c0_84, %c0_85], %134 {strides = array<i32>} : memref<4x16xf32, #tpu.memory_space<vmem>>, vector<4x16xf32>,
    return
  }
}

</mosaic_0001>

<bundles_post_ra>
// kernel: encoder_forward.1
= control target key start
LH: loop header
LB: loop body
LE: loop exit
PB: predicated region body
PF: predicated region fallthrough
CT: control target
= control target key end

     0   :  { %s5265_s0 = inlined_call_operand.vmem [shape: f32[136,128], index: 0, kind: input, shape index: {}]   ;;  %s5266_s1 = inlined_call_operand.vmem [shape: f32[384,128], index: 1, kind: input, shape index: {}]   ;;  %s5267_s2 = inlined_call_operand.vmem [shape: f32[128,8], index: 2, kind: input, shape index: {}]   ;;  %s5268_s3 = inlined_call_operand.vmem [shape: f32[8,128], index: 3, kind: input, shape index: {}]   ;;  %s5269_s4 = inlined_call_operand.vmem [shape: f32[1,8], index: 4, kind: input, shape index: {}]   ;;  %s5270_s5 = inlined_call_operand.vmem [shape: f32[1,8], index: 5, kind: input, shape index: {}]   ;;  %s5271_s6 = inlined_call_operand.vmem [shape: f32[384,128], index: 6, kind: input, shape index: {}]   ;;  %s5272_s7 = inlined_call_operand.vmem [shape: f32[128,16], index: 7, kind: input, shape index: {}]   ;;  %s5273_s8 = inlined_call_operand.vmem [shape: f32[16,128], index: 8, kind: input, shape index: {}]   ;;  %s5274_s9 = inlined_call_operand.vmem [shape: f32[1,16], index: 9, kind: input, shape index: {}]   ;;  %s5275_s10 = inlined_call_operand.vmem [shape: f32[1,16], index: 10, kind: input, shape index: {}]   ;;  %s5276_s11 = inlined_call_operand.vmem [shape: f32[896,288], index: 11, kind: input, shape index: {}]   ;;  %s5277_s12 = inlined_call_operand.vmem [shape: f32[1,288], index: 12, kind: input, shape index: {}]   ;;  %s5278_s13 = inlined_call_operand.vmem [shape: f32[288,128], index: 13, kind: input, shape index: {}]   ;;  %s5279_s14 = inlined_call_operand.vmem [shape: f32[1,128], index: 14, kind: input, shape index: {}]   ;;  %s5280_s15 = inlined_call_operand.vmem [shape: f32[128,16], index: 15, kind: input, shape index: {}]   ;;  %s5281_s16 = inlined_call_operand.vmem [shape: f32[1,16], index: 16, kind: input, shape index: {}]   ;;  %s5282_s17 = inlined_call_operand.hbm [shape: f32[4,16], index: 17, kind: output, shape index: {}]  }
   0x1   :  { %5285 = sst [smem:[#allocation7_spill]] %s5265_s0 }
   0x2   :  { %5286 = sst [smem:[#allocation8_spill]] %s5266_s1 }
   0x3   :  { %s5287_s26 = sld [smem:[#allocation8_spill]] }
   0x9   :  { %v136_v0 = vld [vmem:[%s5287_s26 + $0xf8] sm:$0xff]  ;;  %v135_v2 = vld [vmem:[%s5287_s26 + $0xf0] sm:$0xff]  ;;  %v134_v5 = vld [vmem:[%s5287_s26 + $0xe8] sm:$0xff] }
   0xa   :  { %v120_v1 = vld [vmem:[%s5287_s26 + $0x78] sm:$0xff]  ;;  %2546 = vmatprep.subr.mxu0 %v136_v0  ;;  %v119_v4 = vld [vmem:[%s5287_s26 + $0x70] sm:$0xff]  ;;  %v118_v7 = vld [vmem:[%s5287_s26 + $0x68] sm:$0xff] }
   0xb   :  { %v152_v3 = vld [vmem:[%s5287_s26 + $0x178] sm:$0xff]  ;;  %2547 = vmatpush3.msra.mxu0 %v120_v1  ;;  %v151_v6 = vld [vmem:[%s5287_s26 + $0x170] sm:$0xff]  ;;  %v150_v8 = vld [vmem:[%s5287_s26 + $0x168] sm:$0xff] }
   0xc   :  { %2930 = vmatprep.subr.mxu1 %v152_v3  ;;  %2548 = vmatprep.subr.mxu0 %v135_v2  ;;  %v133_v9 = vld [vmem:[%s5287_s26 + $0xe0] sm:$0xff]  ;;  %v132_v12 = vld [vmem:[%s5287_s26 + $0xd8] sm:$0xff]  ;;  %v131_v15 = vld [vmem:[%s5287_s26 + $0xd0] sm:$0xff] }
   0xd   :  { %2931 = vmatpush3.msra.mxu1 %v152_v3  ;;  %2549 = vmatpush3.msra.mxu0 %v119_v4  ;;  %v117_v10 = vld [vmem:[%s5287_s26 + $0x60] sm:$0xff]  ;;  %v116_v13 = vld [vmem:[%s5287_s26 + $0x58] sm:$0xff]  ;;  %v115_v16 = vld [vmem:[%s5287_s26 + $0x50] sm:$0xff] }
   0xe   :  { %2932 = vmatprep.subr.mxu1 %v151_v6  ;;  %2550 = vmatprep.subr.mxu0 %v134_v5  ;;  %v149_v11 = vld [vmem:[%s5287_s26 + $0x160] sm:$0xff]  ;;  %v148_v14 = vld [vmem:[%s5287_s26 + $0x158] sm:$0xff]  ;;  %v147_v17 = vld [vmem:[%s5287_s26 + $0x150] sm:$0xff] }
   0xf   :  { %2933 = vmatpush3.msra.mxu1 %v151_v6  ;;  %2551 = vmatpush3.msra.mxu0 %v118_v7  ;;  %v130_v18 = vld [vmem:[%s5287_s26 + $0xc8] sm:$0xff]  ;;  %v129_v21 = vld [vmem:[%s5287_s26 + $0xc0] sm:$0xff]  ;;  %v128_v24 = vld [vmem:[%s5287_s26 + $0xb8] sm:$0xff] }
  0x10   :  { %2934 = vmatprep.subr.mxu1 %v150_v8  ;;  %2552 = vmatprep.subr.mxu0 %v133_v9  ;;  %v114_v19 = vld [vmem:[%s5287_s26 + $0x48] sm:$0xff]  ;;  %v113_v22 = vld [vmem:[%s5287_s26 + $0x40] sm:$0xff]  ;;  %v112_v25 = vld [vmem:[%s5287_s26 + $0x38] sm:$0xff] }
  0x11   :  { %2935 = vmatpush3.msra.mxu1 %v150_v8  ;;  %2553 = vmatpush3.msra.mxu0 %v117_v10  ;;  %v146_v20 = vld [vmem:[%s5287_s26 + $0x148] sm:$0xff]  ;;  %v145_v23 = vld [vmem:[%s5287_s26 + $0x140] sm:$0xff]  ;;  %v144_v26 = vld [vmem:[%s5287_s26 + $0x138] sm:$0xff] }
  0x12   :  { %2936 = vmatprep.subr.mxu1 %v149_v11  ;;  %2554 = vmatprep.subr.mxu0 %v132_v12  ;;  %v127_v27 = vld [vmem:[%s5287_s26 + $0xb0] sm:$0xff]  ;;  %v126_v30 = vld [vmem:[%s5287_s26 + $0xa8] sm:$0xff]  ;;  %v125_v33 = vld [vmem:[%s5287_s26 + $0xa0] sm:$0xff] }
  0x13   :  { %2937 = vmatpush3.msra.mxu1 %v149_v11  ;;  %2555 = vmatpush3.msra.mxu0 %v116_v13  ;;  %v111_v28 = vld [vmem:[%s5287_s26 + $0x30] sm:$0xff]  ;;  %v110_v31 = vld [vmem:[%s5287_s26 + $0x28] sm:$0xff]  ;;  %v109_v34 = vld [vmem:[%s5287_s26 + $0x20] sm:$0xff] }
  0x14   :  { %2938 = vmatprep.subr.mxu1 %v148_v14  ;;  %2556 = vmatprep.subr.mxu0 %v131_v15  ;;  %v143_v29 = vld [vmem:[%s5287_s26 + $0x130] sm:$0xff]  ;;  %v142_v32 = vld [vmem:[%s5287_s26 + $0x128] sm:$0xff]  ;;  %v141_v35 = vld [vmem:[%s5287_s26 + $0x120] sm:$0xff] }
  0x15   :  { %2939 = vmatpush3.msra.mxu1 %v148_v14  ;;  %2557 = vmatpush3.msra.mxu0 %v115_v16  ;;  %v124_v36 = vld [vmem:[%s5287_s26 + $0x98] sm:$0xff]  ;;  %v123_v39 = vld [vmem:[%s5287_s26 + $0x90] sm:$0xff]  ;;  %v122_v42 = vld [vmem:[%s5287_s26 + $0x88] sm:$0xff] }
  0x16   :  { %2940 = vmatprep.subr.mxu1 %v147_v17  ;;  %2558 = vmatprep.subr.mxu0 %v130_v18  ;;  %v108_v37 = vld [vmem:[%s5287_s26 + $0x18] sm:$0xff]  ;;  %v107_v40 = vld [vmem:[%s5287_s26 + $0x10] sm:$0xff]  ;;  %v106_v43 = vld [vmem:[%s5287_s26 + $0x8] sm:$0xff] }
  0x17   :  { %2941 = vmatpush3.msra.mxu1 %v147_v17  ;;  %2559 = vmatpush3.msra.mxu0 %v114_v19  ;;  %v140_v38 = vld [vmem:[%s5287_s26 + $0x118] sm:$0xff]  ;;  %v139_v41 = vld [vmem:[%s5287_s26 + $0x110] sm:$0xff]  ;;  %v138_v44 = vld [vmem:[%s5287_s26 + $0x108] sm:$0xff] }
  0x18   :  { %2942 = vmatprep.subr.mxu1 %v146_v20  ;;  %2560 = vmatprep.subr.mxu0 %v129_v21 }
  0x19   :  { %2943 = vmatpush3.msra.mxu1 %v146_v20  ;;  %2561 = vmatpush3.msra.mxu0 %v113_v22 }
  0x1a   :  { %2944 = vmatprep.subr.mxu1 %v145_v23  ;;  %2562 = vmatprep.subr.mxu0 %v128_v24 }
  0x1b   :  { %2945 = vmatpush3.msra.mxu1 %v145_v23  ;;  %2563 = vmatpush3.msra.mxu0 %v112_v25 }
  0x1c   :  { %2946 = vmatprep.subr.mxu1 %v144_v26  ;;  %2564 = vmatprep.subr.mxu0 %v127_v27 }
  0x1d   :  { %2947 = vmatpush3.msra.mxu1 %v144_v26  ;;  %2565 = vmatpush3.msra.mxu0 %v111_v28 }
  0x1e   :  { %2948 = vmatprep.subr.mxu1 %v143_v29  ;;  %2566 = vmatprep.subr.mxu0 %v126_v30 }
  0x1f   :  { %2949 = vmatpush3.msra.mxu1 %v143_v29  ;;  %2567 = vmatpush3.msra.mxu0 %v110_v31 }
  0x20   :  { %2950 = vmatprep.subr.mxu1 %v142_v32  ;;  %2568 = vmatprep.subr.mxu0 %v125_v33 }
  0x21   :  { %2951 = vmatpush3.msra.mxu1 %v142_v32  ;;  %2569 = vmatpush3.msra.mxu0 %v109_v34 }
  0x22   :  { %2952 = vmatprep.subr.mxu1 %v141_v35  ;;  %2570 = vmatprep.subr.mxu0 %v124_v36 }
  0x23   :  { %2953 = vmatpush3.msra.mxu1 %v141_v35  ;;  %2571 = vmatpush3.msra.mxu0 %v108_v37 }
  0x24   :  { %2954 = vmatprep.subr.mxu1 %v140_v38  ;;  %2572 = vmatprep.subr.mxu0 %v123_v39 }
  0x25   :  { %2955 = vmatpush3.msra.mxu1 %v140_v38 }
  0x26   :  { %22 = vsyncpa [#allocation5], 0  ;;  %2573 = vmatpush3.msra.mxu0 %v107_v40  ;;  %2956 = vmatprep.subr.mxu1 %v139_v41  ;;  %v121_v45 = vld [vmem:[%s5287_s26 + $0x80] sm:$0xff]  ;;  %s5288_s20 = sld [smem:[#allocation7_spill]]  ;;  %v419_v54 = vld [vmem:[%s5267_s2 + $0x78] sm:$0xff]  ;;  %v363_v24 = vlaneseq  ;;  %vm3236_vm4 = vmmov 0  }
  0x27   :  { %2574 = vmatprep.subr.mxu0 %v122_v42  ;;  %2957 = vmatpush3.msra.mxu1 %v139_v41  ;;  %v105_v47 = vld [vmem:[%s5287_s26] sm:$0xff]  ;;  %v418_v58 = vld [vmem:[%s5267_s2 + $0x70] sm:$0xff]  ;;  %v417_v61 = vld [vmem:[%s5267_s2 + $0x68] sm:$0xff]  ;;  %vm565_vm5 = vcmask 64512   ;;  %vm626_vm6 = vcmask 1040384   ;;  %vm1130_vm11 = vcmask 130048  }
  0x28   :  { %2575 = vmatpush3.msra.mxu0 %v106_v43  ;;  %2958 = vmatprep.subr.mxu1 %v138_v44  ;;  %v137_v49 = vld [vmem:[%s5287_s26 + $0x100] sm:$0xff]  ;;  %v415_v3 = vld [vmem:[%s5267_s2 + $0x58] sm:$0xff]  ;;  %v414_v6 = vld [vmem:[%s5267_s2 + $0x50] sm:$0xff]  ;;  %v3592_v25 = vshrl.u32 %v363_v24, 7  ;;  %vm2255_vm12 = vcmask 261120   ;;  %vm2493_vm13 = vcmask 125952  }
  0x29   :  { %2576 = vmatprep.subr.mxu0 %v121_v45  ;;  %2959 = vmatpush3.msra.mxu1 %v138_v44  ;;  %v416_v0 = vld [vmem:[%s5267_s2 + $0x60] sm:$0xff]  ;;  %v413_v8 = vld [vmem:[%s5267_s2 + $0x48] sm:$0xff]  ;;  %v411_v12 = vld [vmem:[%s5267_s2 + $0x38] sm:$0xff] }
  0x2a   :  { %2577 = vmatpush3.msra.mxu0 %v105_v47  ;;  %2960 = vmatprep.subr.mxu1 %v137_v49  ;;  %v412_v10 = vld [vmem:[%s5267_s2 + $0x40] sm:$0xff]  ;;  %v410_v14 = vld [vmem:[%s5267_s2 + $0x30] sm:$0xff]  ;;  %v409_v16 = vld [vmem:[%s5267_s2 + $0x28] sm:$0xff]  ;;  %v3595_v27 = vadd.s32 8, %v3592_v25  ;;  %v3606_v40 = vadd.s32 24, %v3592_v25 }
  0x2b   :  { %2961 = vmatpush3.msra.mxu1 %v137_v49  ;;  %2974 = vmatprep.subr.mxu0 %v419_v54  ;;  %v408_v19 = vld [vmem:[%s5267_s2 + $0x20] sm:$0xff]  ;;  %v407_v20 = vld [vmem:[%s5267_s2 + $0x18] sm:$0xff]  ;;  %v406_v21 = vld [vmem:[%s5267_s2 + $0x10] sm:$0xff] }
  0x2c   :  { %v2517_v46 = vld [vmem:[%s5288_s20 + $0x8] ss:$2 sm:$0xff]  ;;  %v2509_v48 = vld [vmem:[%s5288_s20 + $0x7] ss:$2 sm:$0xff]  ;;  %v2518_v52 = vld [vmem:[%s5288_s20 + $0x18] ss:$2 sm:$0xff] }
  0x2d   :  { %217 = vmatprep.mubr.f32.mxu0 %v2517_v46  ;;  %v2525_v50 = vld [vmem:[%s5288_s20 + $0x9] ss:$2 sm:$0xff]  ;;  %v2526_v51 = vld [vmem:[%s5288_s20 + $0x19] ss:$2 sm:$0xff]  ;;  %v2519_v56 = vld [vmem:[%s5288_s20 + $0x28] ss:$2 sm:$0xff] }
  0x2e   :  { %218 = vmatmul.mubr.f32.vlgmr.msra.gmra.mxu0 %v2509_v48  ;;  %v2527_v53 = vld [vmem:[%s5288_s20 + $0x29] ss:$2 sm:$0xff]  ;;  %2962 = vmatprep.mubr.f32.mxu1 %v2525_v50  ;;  %v2528_v57 = vld [vmem:[%s5288_s20 + $0x39] ss:$2 sm:$0xff]  ;;  %v2520_v62 = vld [vmem:[%s5288_s20 + $0x38] ss:$2 sm:$0xff] }
  0x2f   :  { %v2510_v55 = vld [vmem:[%s5288_s20 + $0x17] ss:$2 sm:$0xff]  ;;  %2963 = vmatmul.mubr.f32.vlgmr.msra.gmra.mxu1 %v2526_v51  ;;  %222 = vmatprep.mubr.f32.mxu0 %v2518_v52  ;;  %v2511_v60 = vld [vmem:[%s5288_s20 + $0x27] ss:$2 sm:$0xff]  ;;  %v2521_v4 = vld [vmem:[%s5288_s20 + $0x48] ss:$2 sm:$0xff] }
  0x30   :  { %2965 = vmatprep.mubr.f32.mxu1 %v2527_v53  ;;  %v2529_v59 = vld [vmem:[%s5288_s20 + $0x49] ss:$2 sm:$0xff]  ;;  %2975 = vmatpush3.msra.mxu0 %v419_v54  ;;  %v2530_v63 = vld [vmem:[%s5288_s20 + $0x59] ss:$2 sm:$0xff]  ;;  %v2522_v9 = vld [vmem:[%s5288_s20 + $0x58] ss:$2 sm:$0xff] }
  0x31   :  { %2976 = vmatprep.subr.mxu0 %v418_v58  ;;  %v2531_v1 = vld [vmem:[%s5288_s20 + $0x69] ss:$2 sm:$0xff]  ;;  %v2532_v5 = vld [vmem:[%s5288_s20 + $0x79] ss:$2 sm:$0xff]  ;;  %v2523_v13 = vld [vmem:[%s5288_s20 + $0x68] ss:$2 sm:$0xff] }
  0x32   :  { %223 = vmatmul.mubr.f32.gmra.mxu0 %v2510_v55  ;;  %v2512_v2 = vld [vmem:[%s5288_s20 + $0x37] ss:$2 sm:$0xff]  ;;  %v2513_v7 = vld [vmem:[%s5288_s20 + $0x47] ss:$2 sm:$0xff]  ;;  %v2524_v17 = vld [vmem:[%s5288_s20 + $0x78] ss:$2 sm:$0xff] }
  0x33   :  { %227 = vmatprep.mubr.f32.mxu0 %v2519_v56  ;;  %2966 = vmatmul.mubr.f32.gmra.mxu1 %v2528_v57  ;;  %v2514_v11 = vld [vmem:[%s5288_s20 + $0x57] ss:$2 sm:$0xff]  ;;  %v2515_v15 = vld [vmem:[%s5288_s20 + $0x67] ss:$2 sm:$0xff]  ;;  %v373_v33 = vand.u32 15, %v3595_v27  ;;  %v375_v46 = vand.u32 15, %v3606_v40 }
  0x34   :  { %2968 = vmatprep.mubr.f32.mxu1 %v2529_v59  ;;  %2977 = vmatpush3.msra.mxu0 %v418_v58  ;;  %v2516_v18 = vld [vmem:[%s5288_s20 + $0x77] ss:$2 sm:$0xff]  ;;  %v405_v22 = vld [vmem:[%s5267_s2 + $0x8] sm:$0xff]  ;;  %v369_v53 = vadd.s32 40, %v3592_v25 }
  0x35   :  { %2978 = vmatprep.subr.mxu0 %v417_v61  ;;  %v404_v23 = vld [vmem:[%s5267_s2] sm:$0xff]  ;;  %vm3601_vm0 = vcmp.lt.s32.totalorder %v373_v33, 14  ;;  %vm3614_vm1 = vcmp.lt.s32.totalorder %v375_v46, 14  ;;  %v820_v33 = vld [vmem:[%s5271_s6 + $0x168] sm:$0xff]  ;;  %s3237_s2 = smov [#allocation4]  }
  0x36   :  { %228 = vmatmul.mubr.f32.gmra.mxu0 %v2511_v60  ;;  %v377_v59 = vand.u32 15, %v369_v53 }
  0x37   :  { %232 = vmatprep.mubr.f32.mxu0 %v2520_v62  ;;  %2979 = vmatpush3.msra.mxu0 %v417_v61 }
  0x38   :  { %2969 = vmatmul.mubr.f32.gmra.mxu1 %v2530_v63  ;;  %2980 = vmatprep.subr.mxu0 %v416_v0  ;;  %vm3624_vm2 = vcmp.lt.s32.totalorder %v377_v59, 14 }
  0x39   :  { %2971 = vmatprep.mubr.f32.mxu1 %v2531_v1  ;;  %2981 = vmatpush3.msra.mxu0 %v416_v0  ;;  %v1023_v1 = vld [vmem:[%s5272_s7 + $0x70] sm:$0xff] }
  0x3a   :  { %233 = vmatmul.mubr.f32.gmra.mxu0 %v2512_v2  ;;  %2982 = vmatprep.subr.mxu0 %v415_v3  ;;  %v371_v2 = vadd.s32 56, %v3592_v25 }
  0x3b   :  { %237 = vmatprep.mubr.f32.mxu0 %v2521_v4  ;;  %2983 = vmatpush3.msra.mxu0 %v415_v3 }
  0x3c   :  { %2972 = vmatmul.mubr.f32.gmra.mxu1 %v2532_v5  ;;  %2984 = vmatprep.subr.mxu0 %v414_v6 }
  0x3d   :  { %2985 = vmatpush3.msra.mxu0 %v414_v6 }
  0x3e   :  { %238 = vmatmul.mubr.f32.gmra.mxu0 %v2513_v7  ;;  %2986 = vmatprep.subr.mxu0 %v413_v8 }
  0x3f   :  { %242 = vmatprep.mubr.f32.mxu0 %v2522_v9  ;;  %2987 = vmatpush3.msra.mxu0 %v413_v8  ;;  %v379_v8 = vand.u32 15, %v371_v2 }
  0x40   :  { %2988 = vmatprep.subr.mxu0 %v412_v10 }
  0x41   :  { %2989 = vmatpush3.msra.mxu0 %v412_v10  ;;  %vm3634_vm3 = vcmp.lt.s32.totalorder %v379_v8, 14 }
  0x42   :  { %243 = vmatmul.mubr.f32.gmra.mxu0 %v2514_v11  ;;  %2990 = vmatprep.subr.mxu0 %v411_v12 }
  0x43   :  { %247 = vmatprep.mubr.f32.mxu0 %v2523_v13  ;;  %2991 = vmatpush3.msra.mxu0 %v411_v12 }
  0x44   :  { %2992 = vmatprep.subr.mxu0 %v410_v14 }
  0x45   :  { %2993 = vmatpush3.msra.mxu0 %v410_v14 }
  0x46   :  { %248 = vmatmul.mubr.f32.gmra.mxu0 %v2515_v15  ;;  %2994 = vmatprep.subr.mxu0 %v409_v16 }
  0x47   :  { %252 = vmatprep.mubr.f32.mxu0 %v2524_v17  ;;  %2995 = vmatpush3.msra.mxu0 %v409_v16 }
  0x48   :  { %2996 = vmatprep.subr.mxu0 %v408_v19 }
  0x49   :  { %2997 = vmatpush3.msra.mxu0 %v408_v19 }
  0x4a   :  { %253 = vmatmul.mubr.f32.gmra.mxu0 %v2516_v18  ;;  %2998 = vmatprep.subr.mxu0 %v407_v20 }
  0x4b   :  { %2999 = vmatpush3.msra.mxu0 %v407_v20 }
  0x4c   :  { %3000 = vmatprep.subr.mxu0 %v406_v21 }
  0x4d   :  { %3001 = vmatpush3.msra.mxu0 %v406_v21 }
  0x4e   :  { %3002 = vmatprep.subr.mxu0 %v405_v22 }
  0x4f   :  { %3003 = vmatpush3.msra.mxu0 %v405_v22 }
  0x50   :  { %3004 = vmatprep.subr.mxu0 %v404_v23 }
  0x51   :  { %3005 = vmatpush3.msra.mxu0 %v404_v23 }
  0xee   :  { %v2578_v26 = vpop.f32.mrf.mxu0 }
  0xef   :  { %v2964_v29 = vpop.f32.mrf.mxu1 }
  0xf0   :  { %v2579_v28 = vpop.f32.mrf.mxu0 }
  0xf1   :  { %v2580_v30 = vadd.f32 %v2579_v28, %v2578_v26  ;;  %v324_v32 = vpop.f32.mrf.mxu1  ;;  %v628_v28 = vld [vmem:[%s5268_s3] sm:$0xff] }
  0xf2   :  { %v2581_v31 = vpop.f32.mrf.mxu0 }
  0xf3   :  { %v3598_v34 = vadd.f32 %v2580_v30, %v324_v32  ;;  %v2967_v36 = vpop.f32.mrf.mxu1  ;;  %v806_v30 = vld [vmem:[%s5271_s6 + $0xf8] sm:$0xff]  ;;  %v821_v32 = vld [vmem:[%s5271_s6 + $0x170] sm:$0xff] }
  0xf4   :  { %v2582_v35 = vpop.f32.mrf.mxu0 }
  0xf5   :  { %v2583_v37 = vadd.f32 %v2582_v35, %v2581_v31  ;;  %3006 = vmatprep.mubr.f32.mxu0 %v3598_v34  ;;  %v334_v43 = vpop.f32.mrf.mxu1  ;;  %v396_v15 = vmul.f32 %v3598_v34, %v3598_v34  ;;  %v822_v31 = vld [vmem:[%s5271_s6 + $0x178] sm:$0xff]  ;;  %v819_v35 = vld [vmem:[%s5271_s6 + $0x160] sm:$0xff] }
  0xf6   :  { %v2584_v39 = vpop.f32.mrf.mxu0  ;;  %3035 = vmatprep.subr.mxu0 %v822_v31 }
  0xf7   :  { %v330_v41 = vadd.f32 %v2964_v29, %v2583_v37  ;;  %v3235_v29 = vmov 0.0   ;;  %v817_v37 = vld [vmem:[%s5271_s6 + $0x150] sm:$0xff] }
  0xf8   :  { %v2585_v42 = vpop.f32.mrf.mxu0  ;;  %v2970_v49 = vpop.f32.mrf.mxu1  ;;  %3030 = vmatprep.subr.mxu1 %v3235_v29  ;;  %742 = vst [vmem:[#allocation2] sm:$0xff] %v3235_v29  ;;  %3032 = vmatprep.mubr.msk.f32.mxu1 %vm3236_vm4, %v3235_v29 }
  0xf9   :  { %v2586_v44 = vadd.f32 %v2585_v42, %v2584_v39  ;;  %3007 = vmatmul.mubr.msk.f32.vlgmr.msra.gmra.mxu0 %vm3601_vm0, %v330_v41  ;;  %v3640_v14 = vsel %vm3601_vm0, %v330_v41, 0.0  ;;  %3031 = vmatpush3.msra.mxu1 %v628_v28  ;;  %v816_v39 = vld [vmem:[%s5271_s6 + $0x148] sm:$0xff] }
  0xfa   :  { %v2587_v45 = vpop.f32.mrf.mxu0  ;;  %v344_v56 = vpop.f32.mrf.mxu1  ;;  %v397_v16 = vmul.f32 %v3640_v14, %v3640_v14  ;;  %2660 = vmatprep.subr.mxu1 %v806_v30  ;;  %3036 = vmatpush3.msra.mxu0 %v822_v31 }
  0xfb   :  { %v3611_v47 = vadd.f32 %v2586_v44, %v334_v43  ;;  %3037 = vmatprep.subr.mxu0 %v821_v32 }
  0xfc   :  { %v2588_v48 = vpop.f32.mrf.mxu0  ;;  %v2973_v62 = vpop.f32.mrf.mxu1  ;;  %3038 = vmatpush3.msra.mxu0 %v821_v32 }
  0xfd   :  { %v2589_v50 = vadd.f32 %v2588_v48, %v2587_v45  ;;  %3009 = vmatprep.mubr.f32.mxu0 %v3611_v47  ;;  %v398_v17 = vmul.f32 %v3611_v47, %v3611_v47  ;;  %3039 = vmatprep.subr.mxu0 %v820_v33 }
  0xfe   :  { %v2590_v51 = vpop.f32.mrf.mxu0  ;;  %v354_v5 = vpop.f32.mrf.mxu1  ;;  %3040 = vmatpush3.msra.mxu0 %v820_v33 }
  0xff   :  { %v340_v54 = vadd.f32 %v2967_v36, %v2589_v50  ;;  %3041 = vmatprep.subr.mxu0 %v819_v35  ;;  %v818_v36 = vld [vmem:[%s5271_s6 + $0x158] sm:$0xff] }
 0x100   :  { %v2591_v55 = vpop.f32.mrf.mxu0  ;;  %3042 = vmatpush3.msra.mxu0 %v819_v35 }
 0x101   :  { %v2592_v57 = vadd.f32 %v2591_v55, %v2590_v51  ;;  %3010 = vmatmul.mubr.msk.f32.gmra.mxu0 %vm3614_vm1, %v340_v54  ;;  %v3652_v18 = vsel %vm3614_vm1, %v340_v54, 0.0  ;;  %3043 = vmatprep.subr.mxu0 %v818_v36 }
 0x102   :  { %v2593_v58 = vpop.f32.mrf.mxu0  ;;  %v399_v19 = vmul.f32 %v3652_v18, %v3652_v18  ;;  %3044 = vmatpush3.msra.mxu0 %v818_v36 }
 0x103   :  { %v3621_v60 = vadd.f32 %v2592_v57, %v344_v56  ;;  %3045 = vmatprep.subr.mxu0 %v817_v37 }
 0x104   :  { %v2594_v61 = vpop.f32.mrf.mxu0  ;;  %3046 = vmatpush3.msra.mxu0 %v817_v37 }
 0x105   :  { %v2595_v63 = vadd.f32 %v2594_v61, %v2593_v58  ;;  %3012 = vmatprep.mubr.f32.mxu0 %v3621_v60  ;;  %v400_v20 = vmul.f32 %v3621_v60, %v3621_v60  ;;  %3047 = vmatprep.subr.mxu0 %v816_v39 }
 0x106   :  { %v2596_v0 = vpop.f32.mrf.mxu0  ;;  %3048 = vmatpush3.msra.mxu0 %v816_v39 }
 0x107   :  { %v350_v3 = vadd.f32 %v2970_v49, %v2595_v63 }
 0x108   :  { %v2597_v4 = vpop.f32.mrf.mxu0 }
 0x109   :  { %v2598_v6 = vadd.f32 %v2597_v4, %v2596_v0  ;;  %3013 = vmatmul.mubr.msk.f32.gmra.mxu0 %vm3624_vm2, %v350_v3  ;;  %v3660_v21 = vsel %vm3624_vm2, %v350_v3, 0.0 }
 0x10a   :  { %v2599_v7 = vpop.f32.mrf.mxu0  ;;  %v401_v22 = vmul.f32 %v3660_v21, %v3660_v21 }
 0x10b   :  { %v3631_v9 = vadd.f32 %v2598_v6, %v354_v5 }
 0x10c   :  { %v2600_v10 = vpop.f32.mrf.mxu0 }
 0x10d   :  { %v2601_v11 = vadd.f32 %v2600_v10, %v2599_v7  ;;  %3015 = vmatprep.mubr.f32.mxu0 %v3631_v9  ;;  %v402_v23 = vmul.f32 %v3631_v9, %v3631_v9 }
 0x10f   :  { %v360_v13 = vadd.f32 %v2973_v62, %v2601_v11 }
 0x111   :  { %3016 = vmatmul.mubr.msk.f32.gmra.mxu0 %vm3634_vm3, %v360_v13  ;;  %v3668_v24 = vsel %vm3634_vm3, %v360_v13, 0.0 }
 0x112   :  { %3018 = vmatprep.mubr.f32.mxu0 %v396_v15  ;;  %v403_v26 = vmul.f32 %v3668_v24, %v3668_v24 }
 0x115   :  { %3019 = vmatmul.mubr.f32.gmra.mxu0 %v397_v16 }
 0x116   :  { %3021 = vmatprep.mubr.f32.mxu0 %v398_v17 }
 0x119   :  { %3022 = vmatmul.mubr.f32.gmra.mxu0 %v399_v19 }
 0x11a   :  { %3024 = vmatprep.mubr.f32.mxu0 %v400_v20 }
 0x11d   :  { %3025 = vmatmul.mubr.f32.gmra.mxu0 %v401_v22 }
 0x11e   :  { %3027 = vmatprep.mubr.f32.mxu0 %v402_v23 }
 0x121   :  { %3028 = vmatmul.mubr.f32.gmra.mxu0 %v403_v26 }
 0x1b9   :  { %v3008_v41 = vpop.f32.mrf.mxu0 }
 0x1ba   :  { %v567_v46 = vsel %vm565_vm5, %v3008_v41, 0.0 }
 0x1bb   :  { %v486_v42 = vpop.f32.mrf.mxu0 }
 0x1bc   :  { %v566_v45 = vsel %vm565_vm5, %v486_v42, 0.0 }
 0x1bd   :  { %v568_v49 = vadd.f32 %v567_v46, %v566_v45 }
 0x1c1   :  { %v3011_v43 = vpop.f32.mrf.mxu0 }
 0x1c2   :  { %v571_v54 = vsel %vm565_vm5, %v3011_v43, 0.0 }
 0x1c3   :  { %v496_v44 = vpop.f32.mrf.mxu0 }
 0x1c4   :  { %v569_v48 = vsel %vm565_vm5, %v496_v44, 0.0 }
 0x1c5   :  { %v570_v50 = vadd.f32 %v569_v48, %v568_v49 }
 0x1c7   :  { %v572_v56 = vadd.f32 %v571_v54, %v570_v50 }
 0x1c9   :  { %v3014_v51 = vpop.f32.mrf.mxu0 }
 0x1ca   :  { %v575_v59 = vsel %vm565_vm5, %v3014_v51, 0.0 }
 0x1cb   :  { %v506_v53 = vpop.f32.mrf.mxu0 }
 0x1cc   :  { %v573_v55 = vsel %vm565_vm5, %v506_v53, 0.0 }
 0x1cd   :  { %v574_v57 = vadd.f32 %v573_v55, %v572_v56 }
 0x1cf   :  { %v576_v62 = vadd.f32 %v575_v59, %v574_v57  ;;  %v613_v59 = vld [vmem:[%s5269_s4] sm:$0x1] }
 0x1d1   :  { %v3017_v58 = vpop.f32.mrf.mxu0 }
 0x1d2   :  { %v579_v3 = vsel %vm565_vm5, %v3017_v58, 0.0 }
 0x1d3   :  { %v516_v61 = vpop.f32.mrf.mxu0 }
 0x1d4   :  { %v577_v63 = vsel %vm565_vm5, %v516_v61, 0.0 }
 0x1d5   :  { %v578_v0 = vadd.f32 %v577_v63, %v576_v62  ;;  %v3020_v2 = vpop.f32.mrf.mxu0  ;;  %v617_v63 = vld [vmem:[%s5270_s5] sm:$0x1] }
 0x1d6   :  { %v588_v10 = vsel %vm565_vm5, %v3020_v2, 0.0  ;;  %v3726_v2 = vsub.s32 0, %v3592_v25 }
 0x1d7   :  { %v580_v4 = vadd.f32 %v579_v3, %v578_v0  ;;  %v526_v5 = vpop.f32.mrf.mxu0 }
 0x1d8   :  { %v587_v6 = vsel %vm565_vm5, %v526_v5, 0.0  ;;  %v790_v5 = vld [vmem:[%s5271_s6 + $0x78] sm:$0xff] }
 0x1d9   :  { %v581_v7 = vrot.slane %v580_v4, 4  ;;  %v3023_v8 = vpop.f32.mrf.mxu0  ;;  %v589_v11 = vadd.f32 %v588_v10, %v587_v6  ;;  %v804_v10 = vld [vmem:[%s5271_s6 + $0xe8] sm:$0xff] }
 0x1da   :  { %v592_v20 = vsel %vm565_vm5, %v3023_v8, 0.0  ;;  %v789_v8 = vld [vmem:[%s5271_s6 + $0x70] sm:$0xff] }
 0x1db   :  { %v536_v13 = vpop.f32.mrf.mxu0  ;;  %v582_v16 = vadd.f32 %v581_v7, %v580_v4  ;;  %v805_v7 = vld [vmem:[%s5271_s6 + $0xf0] sm:$0xff] }
 0x1dc   :  { %v590_v15 = vsel %vm565_vm5, %v536_v13, 0.0  ;;  %v803_v13 = vld [vmem:[%s5271_s6 + $0xe0] sm:$0xff] }
 0x1dd   :  { %v591_v17 = vadd.f32 %v590_v15, %v589_v11  ;;  %v3026_v19 = vpop.f32.mrf.mxu0  ;;  %v583_v28 = vrot.slane %v582_v16, 2  ;;  %v788_v11 = vld [vmem:[%s5271_s6 + $0x68] sm:$0xff]  ;;  %v787_v15 = vld [vmem:[%s5271_s6 + $0x60] sm:$0xff] }
 0x1de   :  { %v596_v32 = vsel %vm565_vm5, %v3026_v19, 0.0  ;;  %v801_v19 = vld [vmem:[%s5271_s6 + $0xd0] sm:$0xff] }
 0x1df   :  { %v546_v22 = vpop.f32.mrf.mxu0  ;;  %v593_v23 = vadd.f32 %v592_v20, %v591_v17  ;;  %v584_v37 = vadd.f32 %v583_v28, %v582_v16  ;;  %v802_v16 = vld [vmem:[%s5271_s6 + $0xd8] sm:$0xff]  ;;  %v785_v20 = vld [vmem:[%s5271_s6 + $0x50] sm:$0xff]  ;;  %v815_v28 = vld [vmem:[%s5271_s6 + $0x140] sm:$0xff] }
 0x1e0   :  { %v594_v26 = vsel %vm565_vm5, %v546_v22, 0.0  ;;  %v786_v17 = vld [vmem:[%s5271_s6 + $0x58] sm:$0xff]  ;;  %v800_v22 = vld [vmem:[%s5271_s6 + $0xc8] sm:$0xff]  ;;  %3049 = vmatprep.subr.mxu0 %v815_v28 }
 0x1e1   :  { %v595_v30 = vadd.f32 %v594_v26, %v593_v23  ;;  %v3029_v31 = vpop.f32.mrf.mxu0  ;;  %v585_v43 = vrot.slane %v584_v37, 1  ;;  %v784_v23 = vld [vmem:[%s5271_s6 + $0x48] sm:$0xff]  ;;  %v799_v26 = vld [vmem:[%s5271_s6 + $0xc0] sm:$0xff]  ;;  %3050 = vmatpush3.msra.mxu0 %v815_v28 }
 0x1e2   :  { %v600_v41 = vsel %vm565_vm5, %v3029_v31, 0.0  ;;  %v798_v31 = vld [vmem:[%s5271_s6 + $0xb8] sm:$0xff] }
 0x1e3   :  { %v556_v33 = vpop.f32.mrf.mxu0  ;;  %v597_v35 = vadd.f32 %v596_v32, %v595_v30  ;;  %v586_v46 = vadd.f32 %v585_v43, %v584_v37  ;;  %v783_v30 = vld [vmem:[%s5271_s6 + $0x40] sm:$0xff]  ;;  %v814_v32 = vld [vmem:[%s5271_s6 + $0x138] sm:$0xff]  ;;  %v781_v37 = vld [vmem:[%s5271_s6 + $0x30] sm:$0xff] }
 0x1e4   :  { %v598_v36 = vsel %vm565_vm5, %v556_v33, 0.0  ;;  %3051 = vmatprep.subr.mxu0 %v814_v32  ;;  %v782_v33 = vld [vmem:[%s5271_s6 + $0x38] sm:$0xff]  ;;  %v795_v43 = vld [vmem:[%s5271_s6 + $0xa0] sm:$0xff] }
 0x1e5   :  { %v599_v39 = vadd.f32 %v598_v36, %v597_v35  ;;  %v608_v50 = vmul.f32 0.0012755102, %v586_v46  ;;  %3052 = vmatpush3.msra.mxu0 %v814_v32  ;;  %v797_v35 = vld [vmem:[%s5271_s6 + $0xb0] sm:$0xff]  ;;  %v794_v46 = vld [vmem:[%s5271_s6 + $0x98] sm:$0xff] }
 0x1e6   :  { %v813_v36 = vld [vmem:[%s5271_s6 + $0x130] sm:$0xff] }
 0x1e7   :  { %v601_v42 = vadd.f32 %v600_v41, %v599_v39  ;;  %v610_v54 = vmul.f32 %v608_v50, %v608_v50  ;;  %3053 = vmatprep.subr.mxu0 %v813_v36  ;;  %v796_v39 = vld [vmem:[%s5271_s6 + $0xa8] sm:$0xff] }
 0x1e8   :  { %3054 = vmatpush3.msra.mxu0 %v813_v36  ;;  %v812_v41 = vld [vmem:[%s5271_s6 + $0x128] sm:$0xff] }
 0x1e9   :  { %v602_v44 = vrot.slane %v601_v42, 4  ;;  %3055 = vmatprep.subr.mxu0 %v812_v41 }
 0x1ea   :  { %3056 = vmatpush3.msra.mxu0 %v812_v41 }
 0x1eb   :  { %v603_v45 = vadd.f32 %v602_v44, %v601_v42  ;;  %v780_v42 = vld [vmem:[%s5271_s6 + $0x28] sm:$0xff]  ;;  %v811_v44 = vld [vmem:[%s5271_s6 + $0x120] sm:$0xff] }
 0x1ec   :  { %3057 = vmatprep.subr.mxu0 %v811_v44 }
 0x1ed   :  { %v604_v48 = vrot.slane %v603_v45, 2  ;;  %3058 = vmatpush3.msra.mxu0 %v811_v44  ;;  %v1021_v44 = vld [vmem:[%s5272_s7 + $0x60] sm:$0xff] }
 0x1ef   :  { %v605_v49 = vadd.f32 %v604_v48, %v603_v45  ;;  %v779_v45 = vld [vmem:[%s5271_s6 + $0x20] sm:$0xff]  ;;  %v810_v48 = vld [vmem:[%s5271_s6 + $0x118] sm:$0xff] }
 0x1f0   :  { %3059 = vmatprep.subr.mxu0 %v810_v48 }
 0x1f1   :  { %v606_v51 = vrot.slane %v605_v49, 1  ;;  %3060 = vmatpush3.msra.mxu0 %v810_v48 }
 0x1f3   :  { %v607_v53 = vadd.f32 %v606_v51, %v605_v49  ;;  %v778_v49 = vld [vmem:[%s5271_s6 + $0x18] sm:$0xff]  ;;  %v809_v51 = vld [vmem:[%s5271_s6 + $0x110] sm:$0xff] }
 0x1f4   :  { %3061 = vmatprep.subr.mxu0 %v809_v51 }
 0x1f5   :  { %v609_v55 = vmul.f32 0.0012755102, %v607_v53  ;;  %v777_v53 = vld [vmem:[%s5271_s6 + $0x10] sm:$0xff]  ;;  %3062 = vmatpush3.msra.mxu0 %v809_v51  ;;  %v1018_v51 = vld [vmem:[%s5272_s7 + $0x48] sm:$0xff] }
 0x1f7   :  { %v611_v56 = vsub.f32 %v609_v55, %v610_v54  ;;  %v792_v54 = vld [vmem:[%s5271_s6 + $0x88] sm:$0xff] }
 0x1f8   :  { %v808_v55 = vld [vmem:[%s5271_s6 + $0x108] sm:$0xff] }
 0x1f9   :  { %v612_v57 = vmax.f32 %v611_v56, 0.0  ;;  %v776_v56 = vld [vmem:[%s5271_s6 + $0x8] sm:$0xff]  ;;  %3063 = vmatprep.subr.mxu0 %v808_v55 }
 0x1fa   :  { %3064 = vmatpush3.msra.mxu0 %v808_v55  ;;  %v1015_v55 = vld [vmem:[%s5272_s7 + $0x30] sm:$0xff] }
 0x1fb   :  { %v614_v58 = vadd.f32 1e-05, %v612_v57  ;;  %v791_v57 = vld [vmem:[%s5271_s6 + $0x80] sm:$0xff] }
 0x1fd   :  { %3208 = vrsqrt.f32 %v614_v58  ;;  %v807_v58 = vld [vmem:[%s5271_s6 + $0x100] sm:$0xff] }
 0x1fe   :  { %3065 = vmatprep.subr.mxu0 %v807_v58 }
 0x1ff   :  { %3066 = vmatpush3.msra.mxu0 %v807_v58  ;;  %v1012_v58 = vld [vmem:[%s5272_s7 + $0x18] sm:$0xff] }
 0x20a   :  { %v3209_v61 = vpop.eup %3208 }
 0x20b   :  { %v616_v62 = vmul.f32 %v3209_v61, %v613_v59  ;;  %v775_v59 = vld [vmem:[%s5271_s6] sm:$0xff]  ;;  %v1024_v61 = vld [vmem:[%s5272_s7 + $0x78] sm:$0xff] }
 0x20d   :  { %v618_v0 = vmul.f32 %v616_v62, %v608_v50  ;;  %v793_v50 = vld [vmem:[%s5271_s6 + $0x90] sm:$0xff] }
 0x20f   :  { %v619_v3 = vsub.f32 %v617_v63, %v618_v0 }
 0x211   :  { %v624_v4 = vrot.slane %v619_v3, %v3726_v2 }
 0x213   :  { %v627_v6 = vsel %vm626_vm6, %v616_v62, %v624_v4  ;;  %v3855_v62 = vsub.s32 1, %v3592_v25 }
 0x214   :  { %3033 = vmatmul.mubr.msk.f32.vlgmr.msra.gmra.mxu1 %vm565_vm5, %v627_v6 }
 0x215   :  { %2661 = vmatpush3.msra.mxu1 %v790_v5 }
 0x216   :  { %2662 = vmatprep.subr.mxu1 %v805_v7 }
 0x217   :  { %2663 = vmatpush3.msra.mxu1 %v789_v8 }
 0x218   :  { %2664 = vmatprep.subr.mxu1 %v804_v10 }
 0x219   :  { %2665 = vmatpush3.msra.mxu1 %v788_v11 }
 0x21a   :  { %2666 = vmatprep.subr.mxu1 %v803_v13 }
 0x21b   :  { %2667 = vmatpush3.msra.mxu1 %v787_v15 }
 0x21c   :  { %2668 = vmatprep.subr.mxu1 %v802_v16 }
 0x21d   :  { %2669 = vmatpush3.msra.mxu1 %v786_v17 }
 0x21e   :  { %2670 = vmatprep.subr.mxu1 %v801_v19 }
 0x21f   :  { %2671 = vmatpush3.msra.mxu1 %v785_v20 }
 0x220   :  { %2672 = vmatprep.subr.mxu1 %v800_v22 }
 0x221   :  { %2673 = vmatpush3.msra.mxu1 %v784_v23 }
 0x222   :  { %2674 = vmatprep.subr.mxu1 %v799_v26 }
 0x223   :  { %2675 = vmatpush3.msra.mxu1 %v783_v30 }
 0x224   :  { %2676 = vmatprep.subr.mxu1 %v798_v31 }
 0x225   :  { %2677 = vmatpush3.msra.mxu1 %v782_v33 }
 0x226   :  { %2678 = vmatprep.subr.mxu1 %v797_v35 }
 0x227   :  { %2679 = vmatpush3.msra.mxu1 %v781_v37 }
 0x228   :  { %2680 = vmatprep.subr.mxu1 %v796_v39 }
 0x229   :  { %2681 = vmatpush3.msra.mxu1 %v780_v42  ;;  %v1022_v42 = vld [vmem:[%s5272_s7 + $0x68] sm:$0xff] }
 0x22a   :  { %2682 = vmatprep.subr.mxu1 %v795_v43 }
 0x22b   :  { %2683 = vmatpush3.msra.mxu1 %v779_v45 }
 0x22c   :  { %2684 = vmatprep.subr.mxu1 %v794_v46  ;;  %v1020_v46 = vld [vmem:[%s5272_s7 + $0x58] sm:$0xff] }
 0x22d   :  { %2685 = vmatpush3.msra.mxu1 %v778_v49  ;;  %v1019_v49 = vld [vmem:[%s5272_s7 + $0x50] sm:$0xff] }
 0x22e   :  { %2686 = vmatprep.subr.mxu1 %v793_v50 }
 0x22f   :  { %2687 = vmatpush3.msra.mxu1 %v777_v53  ;;  %v1017_v53 = vld [vmem:[%s5272_s7 + $0x40] sm:$0xff] }
 0x230   :  { %2688 = vmatprep.subr.mxu1 %v792_v54  ;;  %v1016_v54 = vld [vmem:[%s5272_s7 + $0x38] sm:$0xff] }
 0x231   :  { %2689 = vmatpush3.msra.mxu1 %v776_v56  ;;  %v1014_v56 = vld [vmem:[%s5272_s7 + $0x28] sm:$0xff] }
 0x232   :  { %2690 = vmatprep.subr.mxu1 %v791_v57  ;;  %v1013_v57 = vld [vmem:[%s5272_s7 + $0x20] sm:$0xff] }
 0x233   :  { %2691 = vmatpush3.msra.mxu1 %v775_v59  ;;  %v1011_v59 = vld [vmem:[%s5272_s7 + $0x10] sm:$0xff] }
 0x234   :  { %3073 = vmatprep.subr.mxu1 %v1024_v61 }
 0x2d4   :  { %v698_v63 = vpop.f32.mrf.mxu1 }
 0x2d5   :  { %v705_v0 = vrot.slane %v698_v63, %v3726_v2  ;;  %v717_v3 = vrot.slane %v698_v63, %v3855_v62  ;;  %v1009_v63 = vld [vmem:[%s5272_s7] sm:$0xff] }
 0x2d6   :  { %v3034_v4 = vpop.f32.mrf.mxu1 }
 0x2d7   :  { %v706_v5 = vmul.f32 %v705_v0, %v3598_v34  ;;  %v707_v6 = vmul.f32 %v705_v0, %v3640_v14  ;;  %v708_v7 = vmul.f32 %v705_v0, %v3611_v47  ;;  %v709_v8 = vmul.f32 %v705_v0, %v3652_v18 }
 0x2d8   :  { %v710_v10 = vmul.f32 %v705_v0, %v3621_v60  ;;  %v711_v11 = vmul.f32 %v705_v0, %v3660_v21  ;;  %v712_v13 = vmul.f32 %v705_v0, %v3631_v9  ;;  %v713_v15 = vmul.f32 %v705_v0, %v3668_v24 }
 0x2d9   :  { %v718_v16 = vadd.f32 %v717_v3, %v706_v5  ;;  %v719_v17 = vadd.f32 %v717_v3, %v707_v6  ;;  %v720_v19 = vadd.f32 %v717_v3, %v708_v7  ;;  %v721_v20 = vadd.f32 %v717_v3, %v709_v8  ;;  %v1625_v8 = vld [vmem:[%s5276_s11 + $0xa68] sm:$0xff] }
 0x2da   :  { %v722_v22 = vadd.f32 %v717_v3, %v710_v10  ;;  %v723_v34 = vadd.f32 %v717_v3, %v711_v11  ;;  %v724_v23 = vadd.f32 %v717_v3, %v712_v13  ;;  %v725_v14 = vadd.f32 %v717_v3, %v713_v15 }
 0x2db   :  { %v727_v26 = vmax.f32 %v719_v17, 0.0  ;;  %v728_v47 = vmax.f32 %v720_v19, 0.0  ;;  %v729_v28 = vmax.f32 %v721_v20, 0.0  ;;  %v726_v18 = vmax.f32 %v718_v16, 0.0  ;;  %v1527_v20 = vld [vmem:[%s5276_s11 + $0x758] sm:$0xff] }
 0x2dc   :  { %v731_v30 = vmax.f32 %v723_v34, 0.0  ;;  %v733_v60 = vmax.f32 %v725_v14, 0.0  ;;  %v730_v31 = vmax.f32 %v722_v22, 0.0  ;;  %v732_v21 = vmax.f32 %v724_v23, 0.0 }
 0x2dd   :  { %v737_v9 = vsel %vm3614_vm1, %v729_v28, 0.0  ;;  %745 = vst [vmem:[#allocation2 + $0x18] sm:$0xff] %v728_v47  ;;  %v735_v24 = vsel %vm3601_vm0, %v727_v26, 0.0  ;;  %743 = vst [vmem:[#allocation2 + $0x8] sm:$0xff] %v726_v18  ;;  %v993_v4 = vand.u32 7, %v3592_v25  ;;  %v994_v11 = vand.u32 7, %v3595_v27 }
 0x2de   :  { %746 = vst [vmem:[#allocation2 + $0x20] sm:$0xff] %v737_v9  ;;  %744 = vst [vmem:[#allocation2 + $0x10] sm:$0xff] %v735_v24  ;;  %v739_v32 = vsel %vm3624_vm2, %v731_v30, 0.0  ;;  %v741_v33 = vsel %vm3634_vm3, %v733_v60, 0.0  ;;  %v366_v13 = vadd.s32 16, %v3592_v25  ;;  %v996_v18 = vand.u32 7, %v3606_v40 }
 0x2df   :  { %747 = vst [vmem:[#allocation2 + $0x28] sm:$0xff] %v730_v31  ;;  %749 = vst [vmem:[#allocation2 + $0x38] sm:$0xff] %v732_v21  ;;  %vm3922_vm7 = vcmp.lt.s32.totalorder %v993_v4, 7  ;;  %vm3930_vm8 = vcmp.lt.s32.totalorder %v994_v11, 7  ;;  %v1304_v4 = vld [vmem:[%s5276_s11 + $0x60] sm:$0xff] }
 0x2e0   :  { %748 = vst [vmem:[#allocation2 + $0x30] sm:$0xff] %v739_v32  ;;  %750 = vst [vmem:[#allocation2 + $0x40] sm:$0xff] %v741_v33  ;;  %v995_v34 = vand.u32 7, %v366_v13  ;;  %vm3947_vm10 = vcmp.lt.s32.totalorder %v996_v18, 7  ;;  %v1296_v11 = vld [vmem:[%s5276_s11 + $0x20] sm:$0xff]  ;;  %v1295_v13 = vld [vmem:[%s5276_s11 + $0x18] sm:$0xff] }
 0x2e1   :  { %v1373_v18 = vld [vmem:[%s5276_s11 + $0x288] sm:$0xff] }
 0x2e2   :  { %vm3936_vm9 = vcmp.lt.s32.totalorder %v995_v34, 7  ;;  %v1382_v34 = vld [vmem:[%s5276_s11 + $0x2d0] sm:$0xff] }
 0x2e5   :  { %v760_v35 = vld [vmem:[#allocation2 + $0x8] ss:$2 sm:$0xff]  ;;  %v768_v52 = vld [vmem:[#allocation2 + $0x9] ss:$2 sm:$0xff]  ;;  %v770_v38 = vld [vmem:[#allocation2 + $0x19] ss:$2 sm:$0xff] }
 0x2e6   :  { %v752_v36 = vld [vmem:[#allocation2 + $0x7] ss:$2 sm:$0xff]  ;;  %887 = vmatprep.mubr.f32.mxu1 %v760_v35  ;;  %3067 = vmatprep.mubr.f32.mxu0 %v768_v52  ;;  %v762_v37 = vld [vmem:[#allocation2 + $0x18] ss:$2 sm:$0xff]  ;;  %v754_v12 = vld [vmem:[#allocation2 + $0x17] ss:$2 sm:$0xff] }
 0x2e7   :  { %888 = vmatmul.mubr.f32.vlgmr.msra.gmra.mxu1 %v752_v36  ;;  %3068 = vmatmul.mubr.f32.vlgmr.msra.gmra.mxu0 %v770_v38  ;;  %v772_v39 = vld [vmem:[#allocation2 + $0x29] ss:$2 sm:$0xff]  ;;  %v774_v41 = vld [vmem:[#allocation2 + $0x39] ss:$2 sm:$0xff]  ;;  %v764_v43 = vld [vmem:[#allocation2 + $0x28] ss:$2 sm:$0xff] }
 0x2e8   :  { %892 = vmatprep.mubr.f32.mxu1 %v762_v37  ;;  %3070 = vmatprep.mubr.f32.mxu0 %v772_v39  ;;  %v756_v45 = vld [vmem:[#allocation2 + $0x27] ss:$2 sm:$0xff]  ;;  %v766_v48 = vld [vmem:[#allocation2 + $0x38] ss:$2 sm:$0xff]  ;;  %v758_v50 = vld [vmem:[#allocation2 + $0x37] ss:$2 sm:$0xff] }
 0x2e9   :  { %3074 = vmatpush3.msra.mxu1 %v1024_v61  ;;  %v1010_v61 = vld [vmem:[%s5272_s7 + $0x8] sm:$0xff]  ;;  %v1176_v39 = vld [vmem:[%s5273_s8] sm:$0xff] }
 0x2ea   :  { %3075 = vmatprep.subr.mxu1 %v1023_v1  ;;  %v1177_v37 = vld [vmem:[%s5273_s8 + $0x8] sm:$0xff] }
 0x2eb   :  { %893 = vmatmul.mubr.f32.gmra.mxu1 %v754_v12  ;;  %3071 = vmatmul.mubr.f32.gmra.mxu0 %v774_v41  ;;  %v1434_v12 = vld [vmem:[%s5276_s11 + $0x470] sm:$0xff]  ;;  %v1337_v41 = vld [vmem:[%s5276_s11 + $0x168] sm:$0xff] }
 0x2ec   :  { %897 = vmatprep.mubr.f32.mxu1 %v764_v43  ;;  %3076 = vmatpush3.msra.mxu1 %v1023_v1  ;;  %v1338_v1 = vld [vmem:[%s5276_s11 + $0x170] sm:$0xff]  ;;  %v1332_v43 = vld [vmem:[%s5276_s11 + $0x140] sm:$0xff] }
 0x2ed   :  { %3077 = vmatprep.subr.mxu1 %v1022_v42  ;;  %1645 = vmatprep.subr.mxu0 %v1338_v1 }
 0x2ee   :  { %3078 = vmatpush3.msra.mxu1 %v1022_v42  ;;  %v1335_v42 = vld [vmem:[%s5276_s11 + $0x158] sm:$0xff]  ;;  %1646 = vmatpush1.msra.mxu0 %v1337_v41 }
 0x2ef   :  { %898 = vmatmul.mubr.f32.gmra.mxu1 %v756_v45  ;;  %3079 = vmatprep.subr.mxu1 %v1021_v44  ;;  %v1329_v45 = vld [vmem:[%s5276_s11 + $0x128] sm:$0xff] }
 0x2f0   :  { %902 = vmatprep.mubr.f32.mxu1 %v766_v48  ;;  %3080 = vmatpush3.msra.mxu1 %v1021_v44  ;;  %v1331_v44 = vld [vmem:[%s5276_s11 + $0x138] sm:$0xff]  ;;  %v1326_v48 = vld [vmem:[%s5276_s11 + $0x110] sm:$0xff] }
 0x2f1   :  { %3081 = vmatprep.subr.mxu1 %v1020_v46  ;;  %1647 = vmatprep.subr.mxu0 %v1335_v42 }
 0x2f2   :  { %3082 = vmatpush3.msra.mxu1 %v1020_v46  ;;  %v1328_v46 = vld [vmem:[%s5276_s11 + $0x120] sm:$0xff] }
 0x2f3   :  { %903 = vmatmul.mubr.f32.gmra.mxu1 %v758_v50  ;;  %3083 = vmatprep.subr.mxu1 %v1019_v49  ;;  %v1323_v50 = vld [vmem:[%s5276_s11 + $0xf8] sm:$0xff] }
 0x2f4   :  { %3084 = vmatpush3.msra.mxu1 %v1019_v49  ;;  %v1325_v49 = vld [vmem:[%s5276_s11 + $0x108] sm:$0xff] }
 0x2f5   :  { %3085 = vmatprep.subr.mxu1 %v1018_v51 }
 0x2f6   :  { %3086 = vmatpush3.msra.mxu1 %v1018_v51  ;;  %v1322_v51 = vld [vmem:[%s5276_s11 + $0xf0] sm:$0xff] }
 0x2f7   :  { %3087 = vmatprep.subr.mxu1 %v1017_v53 }
 0x2f8   :  { %3088 = vmatpush3.msra.mxu1 %v1017_v53  ;;  %v1320_v53 = vld [vmem:[%s5276_s11 + $0xe0] sm:$0xff] }
 0x2f9   :  { %3089 = vmatprep.subr.mxu1 %v1016_v54 }
 0x2fa   :  { %3090 = vmatpush3.msra.mxu1 %v1016_v54  ;;  %v1319_v54 = vld [vmem:[%s5276_s11 + $0xd8] sm:$0xff] }
 0x2fb   :  { %3091 = vmatprep.subr.mxu1 %v1015_v55 }
 0x2fc   :  { %3092 = vmatpush3.msra.mxu1 %v1015_v55  ;;  %v1317_v55 = vld [vmem:[%s5276_s11 + $0xc8] sm:$0xff] }
 0x2fd   :  { %3093 = vmatprep.subr.mxu1 %v1014_v56 }
 0x2fe   :  { %3094 = vmatpush3.msra.mxu1 %v1014_v56  ;;  %v1316_v56 = vld [vmem:[%s5276_s11 + $0xc0] sm:$0xff] }
 0x2ff   :  { %3095 = vmatprep.subr.mxu1 %v1013_v57 }
 0x300   :  { %3096 = vmatpush3.msra.mxu1 %v1013_v57  ;;  %v1314_v57 = vld [vmem:[%s5276_s11 + $0xb0] sm:$0xff] }
 0x301   :  { %3097 = vmatprep.subr.mxu1 %v1012_v58 }
 0x302   :  { %3098 = vmatpush3.msra.mxu1 %v1012_v58  ;;  %v1313_v58 = vld [vmem:[%s5276_s11 + $0xa8] sm:$0xff] }
 0x303   :  { %3099 = vmatprep.subr.mxu1 %v1011_v59 }
 0x304   :  { %3100 = vmatpush3.msra.mxu1 %v1011_v59  ;;  %v1311_v59 = vld [vmem:[%s5276_s11 + $0x98] sm:$0xff] }
 0x305   :  { %3101 = vmatprep.subr.mxu1 %v1010_v61 }
 0x306   :  { %3102 = vmatpush3.msra.mxu1 %v1010_v61  ;;  %v1310_v61 = vld [vmem:[%s5276_s11 + $0x90] sm:$0xff] }
 0x307   :  { %3103 = vmatprep.subr.mxu1 %v1009_v63 }
 0x308   :  { %3104 = vmatpush3.msra.mxu1 %v1009_v63  ;;  %v1308_v63 = vld [vmem:[%s5276_s11 + $0x80] sm:$0xff] }
 0x309   :  { %3117 = vmatprep.subr.mxu1 %v3235_v29 }
 0x3a7   :  { %v2692_v0 = vpop.f32.mrf.mxu1  ;;  %v3069_v3 = vpop.f32.mrf.mxu0 }
 0x3a9   :  { %v2693_v5 = vpop.f32.mrf.mxu1  ;;  %v974_v7 = vpop.f32.mrf.mxu0 }
 0x3aa   :  { %v2694_v6 = vadd.f32 %v2693_v5, %v2692_v0  ;;  %v1307_v0 = vld [vmem:[%s5276_s11 + $0x78] sm:$0xff]  ;;  %v1302_v5 = vld [vmem:[%s5276_s11 + $0x50] sm:$0xff] }
 0x3ab   :  { %v2695_v10 = vpop.f32.mrf.mxu1  ;;  %v3072_v19 = vpop.f32.mrf.mxu0 }
 0x3ac   :  { %v975_v15 = vadd.f32 %v2694_v6, %v974_v7  ;;  %v1301_v6 = vld [vmem:[%s5276_s11 + $0x48] sm:$0xff]  ;;  %v1299_v7 = vld [vmem:[%s5276_s11 + $0x38] sm:$0xff] }
 0x3ad   :  { %v2696_v16 = vpop.f32.mrf.mxu1  ;;  %v984_v27 = vpop.f32.mrf.mxu0 }
 0x3ae   :  { %v2697_v17 = vadd.f32 %v2696_v16, %v2695_v10  ;;  %3105 = vmatprep.mubr.msk.f32.mxu1 %vm3922_vm7, %v975_v15  ;;  %v3943_v31 = vsel %vm3922_vm7, %v975_v15, 0.0  ;;  %v1298_v10 = vld [vmem:[%s5276_s11 + $0x30] sm:$0xff]  ;;  %v1293_v15 = vld [vmem:[%s5276_s11 + $0x8] sm:$0xff]  ;;  %v1292_v16 = vld [vmem:[%s5276_s11] sm:$0xff] }
 0x3af   :  { %v2698_v22 = vpop.f32.mrf.mxu1  ;;  %v1005_v32 = vmul.f32 %v3943_v31, %v3943_v31 }
 0x3b0   :  { %v980_v23 = vadd.f32 %v3069_v3, %v2697_v17  ;;  %v1305_v3 = vld [vmem:[%s5276_s11 + $0x68] sm:$0xff]  ;;  %v1386_v17 = vld [vmem:[%s5276_s11 + $0x2f0] sm:$0xff] }
 0x3b1   :  { %v2699_v14 = vpop.f32.mrf.mxu1 }
 0x3b2   :  { %v2700_v26 = vadd.f32 %v2699_v14, %v2698_v22  ;;  %3106 = vmatmul.mubr.msk.f32.vlgmr.msra.gmra.mxu1 %vm3930_vm8, %v980_v23  ;;  %v3955_v40 = vsel %vm3930_vm8, %v980_v23, 0.0  ;;  %v1383_v22 = vld [vmem:[%s5276_s11 + $0x2d8] sm:$0xff]  ;;  %v1380_v23 = vld [vmem:[%s5276_s11 + $0x2c0] sm:$0xff] }
 0x3b3   :  { %v2701_v47 = vpop.f32.mrf.mxu1  ;;  %v1006_v35 = vmul.f32 %v3955_v40, %v3955_v40  ;;  %3118 = vmatpush3.msra.mxu1 %v1177_v37  ;;  %v1379_v14 = vld [vmem:[%s5276_s11 + $0x2b8] sm:$0xff] }
 0x3b4   :  { %v985_v30 = vadd.f32 %v2700_v26, %v984_v27  ;;  %3119 = vmatprep.subr.mxu1 %v3235_v29  ;;  %v1377_v26 = vld [vmem:[%s5276_s11 + $0x2a8] sm:$0xff]  ;;  %v1376_v27 = vld [vmem:[%s5276_s11 + $0x2a0] sm:$0xff] }
 0x3b5   :  { %v2702_v60 = vpop.f32.mrf.mxu1  ;;  %3120 = vmatpush3.msra.mxu1 %v1176_v39 }
 0x3b6   :  { %v2703_v21 = vadd.f32 %v2702_v60, %v2701_v47  ;;  %3108 = vmatprep.mubr.msk.f32.mxu1 %vm3936_vm9, %v985_v30  ;;  %v3961_v33 = vsel %vm3936_vm9, %v985_v30, 0.0  ;;  %1716 = vmatprep.subr.mxu1 %v1434_v12  ;;  %v1374_v47 = vld [vmem:[%s5276_s11 + $0x290] sm:$0xff]  ;;  %v1371_v30 = vld [vmem:[%s5276_s11 + $0x278] sm:$0xff] }
 0x3b7   :  { %v1007_v52 = vmul.f32 %v3961_v33, %v3961_v33  ;;  %v1370_v60 = vld [vmem:[%s5276_s11 + $0x270] sm:$0xff] }
 0x3b8   :  { %v990_v24 = vadd.f32 %v3072_v19, %v2703_v21  ;;  %v1385_v19 = vld [vmem:[%s5276_s11 + $0x2e8] sm:$0xff]  ;;  %v1368_v21 = vld [vmem:[%s5276_s11 + $0x260] sm:$0xff] }
 0x3ba   :  { %3109 = vmatmul.mubr.msk.f32.gmra.mxu1 %vm3947_vm10, %v990_v24  ;;  %v3969_v36 = vsel %vm3947_vm10, %v990_v24, 0.0  ;;  %v1367_v24 = vld [vmem:[%s5276_s11 + $0x258] sm:$0xff] }
 0x3bb   :  { %3111 = vmatprep.mubr.f32.mxu1 %v1005_v32  ;;  %v1008_v38 = vmul.f32 %v3969_v36, %v3969_v36 }
 0x3be   :  { %3112 = vmatmul.mubr.f32.gmra.mxu1 %v1006_v35 }
 0x3bf   :  { %3114 = vmatprep.mubr.f32.mxu1 %v1007_v52 }
 0x3c2   :  { %3115 = vmatmul.mubr.f32.gmra.mxu1 %v1008_v38 }
 0x3c3   :  { %3121 = vmatprep.mubr.msk.f32.mxu1 %vm3236_vm4, %v3235_v29  ;;  %v1334_v29 = vld [vmem:[%s5276_s11 + $0x150] sm:$0xff] }
 0x3c4   :  { %1648 = vmatpush1.msra.mxu0 %v1334_v29 }
 0x3c5   :  { %1649 = vmatprep.subr.mxu0 %v1332_v43 }
 0x3c6   :  { %1650 = vmatpush1.msra.mxu0 %v1331_v44 }
 0x3c7   :  { %1651 = vmatprep.subr.mxu0 %v1329_v45 }
 0x3c8   :  { %1652 = vmatpush1.msra.mxu0 %v1328_v46 }
 0x3c9   :  { %1653 = vmatprep.subr.mxu0 %v1326_v48 }
 0x3ca   :  { %1654 = vmatpush1.msra.mxu0 %v1325_v49 }
 0x3cb   :  { %1655 = vmatprep.subr.mxu0 %v1323_v50 }
 0x3cc   :  { %1656 = vmatpush1.msra.mxu0 %v1322_v51 }
 0x3cd   :  { %1657 = vmatprep.subr.mxu0 %v1320_v53 }
 0x3ce   :  { %1658 = vmatpush1.msra.mxu0 %v1319_v54 }
 0x3cf   :  { %1659 = vmatprep.subr.mxu0 %v1317_v55 }
 0x3d0   :  { %1660 = vmatpush1.msra.mxu0 %v1316_v56 }
 0x3d1   :  { %1661 = vmatprep.subr.mxu0 %v1314_v57 }
 0x3d2   :  { %1662 = vmatpush1.msra.mxu0 %v1313_v58 }
 0x3d3   :  { %1663 = vmatprep.subr.mxu0 %v1311_v59 }
 0x3d4   :  { %1664 = vmatpush1.msra.mxu0 %v1310_v61 }
 0x3d5   :  { %1665 = vmatprep.subr.mxu0 %v1308_v63 }
 0x3d6   :  { %1666 = vmatpush1.msra.mxu0 %v1307_v0 }
 0x3d7   :  { %1667 = vmatprep.subr.mxu0 %v1305_v3 }
 0x3d8   :  { %1668 = vmatpush1.msra.mxu0 %v1304_v4 }
 0x3d9   :  { %1669 = vmatprep.subr.mxu0 %v1302_v5 }
 0x3da   :  { %1670 = vmatpush1.msra.mxu0 %v1301_v6 }
 0x3db   :  { %1671 = vmatprep.subr.mxu0 %v1299_v7 }
 0x3dc   :  { %1672 = vmatpush1.msra.mxu0 %v1298_v10 }
 0x3dd   :  { %1673 = vmatprep.subr.mxu0 %v1296_v11 }
 0x3de   :  { %1674 = vmatpush1.msra.mxu0 %v1295_v13 }
 0x3df   :  { %1675 = vmatprep.subr.mxu0 %v1293_v15 }
 0x3e0   :  { %1676 = vmatpush1.msra.mxu0 %v1292_v16 }
 0x3e1   :  { %1677 = vmatprep.subr.mxu0 %v1386_v17 }
 0x3e2   :  { %1678 = vmatpush2.msra.mxu0 %v1385_v19  ;;  %v1162_v19 = vld [vmem:[%s5274_s9] sm:$0x1] }
 0x3e3   :  { %1679 = vmatprep.subr.mxu0 %v1383_v22 }
 0x3e4   :  { %1680 = vmatpush2.msra.mxu0 %v1382_v34 }
 0x3e5   :  { %1681 = vmatprep.subr.mxu0 %v1380_v23  ;;  %v1166_v23 = vld [vmem:[%s5275_s10] sm:$0x1] }
 0x3e6   :  { %1682 = vmatpush2.msra.mxu0 %v1379_v14 }
 0x3e7   :  { %1683 = vmatprep.subr.mxu0 %v1377_v26 }
 0x3e8   :  { %1684 = vmatpush2.msra.mxu0 %v1376_v27 }
 0x3e9   :  { %1685 = vmatprep.subr.mxu0 %v1374_v47  ;;  %v1433_v47 = vld [vmem:[%s5276_s11 + $0x468] sm:$0xff] }
 0x3ea   :  { %1686 = vmatpush2.msra.mxu0 %v1373_v18 }
 0x3eb   :  { %1687 = vmatprep.subr.mxu0 %v1371_v30  ;;  %v1431_v30 = vld [vmem:[%s5276_s11 + $0x458] sm:$0xff] }
 0x3ec   :  { %1688 = vmatpush2.msra.mxu0 %v1370_v60  ;;  %v1430_v60 = vld [vmem:[%s5276_s11 + $0x450] sm:$0xff] }
 0x3ed   :  { %1689 = vmatprep.subr.mxu0 %v1368_v21  ;;  %v1428_v21 = vld [vmem:[%s5276_s11 + $0x440] sm:$0xff] }
 0x3ee   :  { %1690 = vmatpush2.msra.mxu0 %v1367_v24  ;;  %v1427_v24 = vld [vmem:[%s5276_s11 + $0x438] sm:$0xff] }
 0x472   :  { %v3107_v32 = vpop.f32.mrf.mxu1 }
 0x473   :  { %v1132_v37 = vsel %vm1130_vm11, %v3107_v32, 0.0  ;;  %v1425_v32 = vld [vmem:[%s5276_s11 + $0x428] sm:$0xff] }
 0x474   :  { %v1091_v35 = vpop.f32.mrf.mxu1 }
 0x475   :  { %v1131_v52 = vsel %vm1130_vm11, %v1091_v35, 0.0  ;;  %v1424_v35 = vld [vmem:[%s5276_s11 + $0x420] sm:$0xff] }
 0x476   :  { %v1133_v39 = vadd.f32 %v1132_v37, %v1131_v52  ;;  %v1422_v52 = vld [vmem:[%s5276_s11 + $0x410] sm:$0xff]  ;;  %v1419_v37 = vld [vmem:[%s5276_s11 + $0x3f8] sm:$0xff] }
 0x47a   :  { %v3110_v38 = vpop.f32.mrf.mxu1 }
 0x47b   :  { %v1136_v29 = vsel %vm1130_vm11, %v3110_v38, 0.0  ;;  %v1421_v38 = vld [vmem:[%s5276_s11 + $0x408] sm:$0xff] }
 0x47c   :  { %v1101_v1 = vpop.f32.mrf.mxu1 }
 0x47d   :  { %v1134_v12 = vsel %vm1130_vm11, %v1101_v1, 0.0  ;;  %v1416_v1 = vld [vmem:[%s5276_s11 + $0x3e0] sm:$0xff] }
 0x47e   :  { %v1135_v41 = vadd.f32 %v1134_v12, %v1133_v39  ;;  %v3113_v42 = vpop.f32.mrf.mxu1  ;;  %v1418_v39 = vld [vmem:[%s5276_s11 + $0x3f0] sm:$0xff]  ;;  %v1415_v12 = vld [vmem:[%s5276_s11 + $0x3d8] sm:$0xff] }
 0x47f   :  { %v1145_v49 = vsel %vm1130_vm11, %v3113_v42, 0.0  ;;  %v1412_v42 = vld [vmem:[%s5276_s11 + $0x3c0] sm:$0xff] }
 0x480   :  { %v1137_v43 = vadd.f32 %v1136_v29, %v1135_v41  ;;  %v1111_v44 = vpop.f32.mrf.mxu1  ;;  %v1413_v41 = vld [vmem:[%s5276_s11 + $0x3c8] sm:$0xff]  ;;  %v1410_v29 = vld [vmem:[%s5276_s11 + $0x3b0] sm:$0xff] }
 0x481   :  { %v1144_v45 = vsel %vm1130_vm11, %v1111_v44, 0.0  ;;  %v1407_v44 = vld [vmem:[%s5276_s11 + $0x398] sm:$0xff] }
 0x482   :  { %v1138_v46 = vrot.slane %v1137_v43, 4  ;;  %v3116_v48 = vpop.f32.mrf.mxu1  ;;  %v1146_v51 = vadd.f32 %v1145_v49, %v1144_v45  ;;  %v1406_v45 = vld [vmem:[%s5276_s11 + $0x390] sm:$0xff]  ;;  %v1401_v49 = vld [vmem:[%s5276_s11 + $0x368] sm:$0xff] }
 0x483   :  { %v1149_v57 = vsel %vm1130_vm11, %v3116_v48, 0.0  ;;  %v1403_v48 = vld [vmem:[%s5276_s11 + $0x378] sm:$0xff] }
 0x484   :  { %v1139_v50 = vadd.f32 %v1138_v46, %v1137_v43  ;;  %v1121_v53 = vpop.f32.mrf.mxu1  ;;  %v1409_v43 = vld [vmem:[%s5276_s11 + $0x3a8] sm:$0xff]  ;;  %v1404_v46 = vld [vmem:[%s5276_s11 + $0x380] sm:$0xff] }
 0x485   :  { %v1147_v54 = vsel %vm1130_vm11, %v1121_v53, 0.0  ;;  %v1397_v53 = vld [vmem:[%s5276_s11 + $0x348] sm:$0xff] }
 0x486   :  { %v1140_v55 = vrot.slane %v1139_v50, 2  ;;  %v1148_v56 = vadd.f32 %v1147_v54, %v1146_v51  ;;  %v1398_v51 = vld [vmem:[%s5276_s11 + $0x350] sm:$0xff]  ;;  %v1395_v54 = vld [vmem:[%s5276_s11 + $0x338] sm:$0xff] }
 0x488   :  { %v1141_v58 = vadd.f32 %v1140_v55, %v1139_v50  ;;  %v1150_v59 = vadd.f32 %v1149_v57, %v1148_v56  ;;  %v1400_v50 = vld [vmem:[%s5276_s11 + $0x360] sm:$0xff]  ;;  %v1394_v55 = vld [vmem:[%s5276_s11 + $0x330] sm:$0xff]  ;;  %v1391_v57 = vld [vmem:[%s5276_s11 + $0x318] sm:$0xff] }
 0x489   :  { %v1392_v56 = vld [vmem:[%s5276_s11 + $0x320] sm:$0xff] }
 0x48a   :  { %v1142_v61 = vrot.slane %v1141_v58, 1  ;;  %v1151_v63 = vrot.slane %v1150_v59, 4 }
 0x48c   :  { %v1152_v0 = vadd.f32 %v1151_v63, %v1150_v59  ;;  %v1143_v3 = vadd.f32 %v1142_v61, %v1141_v58  ;;  %v1389_v58 = vld [vmem:[%s5276_s11 + $0x308] sm:$0xff]  ;;  %v1388_v59 = vld [vmem:[%s5276_s11 + $0x300] sm:$0xff]  ;;  %v1482_v61 = vld [vmem:[%s5276_s11 + $0x5f0] sm:$0xff] }
 0x48d   :  { %v1481_v63 = vld [vmem:[%s5276_s11 + $0x5e8] sm:$0xff] }
 0x48e   :  { %v1153_v4 = vrot.slane %v1152_v0, 2  ;;  %v1157_v6 = vmul.f32 0.0051020407, %v1143_v3  ;;  %v1478_v3 = vld [vmem:[%s5276_s11 + $0x5d0] sm:$0xff] }
 0x490   :  { %v1154_v5 = vadd.f32 %v1153_v4, %v1152_v0  ;;  %v1159_v11 = vmul.f32 %v1157_v6, %v1157_v6  ;;  %v1479_v0 = vld [vmem:[%s5276_s11 + $0x5d8] sm:$0xff]  ;;  %v1476_v4 = vld [vmem:[%s5276_s11 + $0x5c0] sm:$0xff] }
 0x492   :  { %v1155_v7 = vrot.slane %v1154_v5, 1 }
 0x494   :  { %v1156_v10 = vadd.f32 %v1155_v7, %v1154_v5  ;;  %v1475_v5 = vld [vmem:[%s5276_s11 + $0x5b8] sm:$0xff]  ;;  %v1472_v7 = vld [vmem:[%s5276_s11 + $0x5a0] sm:$0xff] }
 0x496   :  { %v1158_v13 = vmul.f32 0.0051020407, %v1156_v10  ;;  %v1470_v10 = vld [vmem:[%s5276_s11 + $0x590] sm:$0xff] }
 0x498   :  { %v1160_v15 = vsub.f32 %v1158_v13, %v1159_v11  ;;  %v1469_v11 = vld [vmem:[%s5276_s11 + $0x588] sm:$0xff]  ;;  %v1467_v13 = vld [vmem:[%s5276_s11 + $0x578] sm:$0xff] }
 0x49a   :  { %v1161_v16 = vmax.f32 %v1160_v15, 0.0  ;;  %v1466_v15 = vld [vmem:[%s5276_s11 + $0x570] sm:$0xff] }
 0x49c   :  { %v1163_v17 = vadd.f32 1e-05, %v1161_v16  ;;  %v1464_v16 = vld [vmem:[%s5276_s11 + $0x560] sm:$0xff] }
 0x49e   :  { %3210 = vrsqrt.f32 %v1163_v17  ;;  %v1463_v17 = vld [vmem:[%s5276_s11 + $0x558] sm:$0xff] }
 0x4ab   :  { %v3211_v22 = vpop.eup %3210 }
 0x4ac   :  { %v1165_v34 = vmul.f32 %v3211_v22, %v1162_v19  ;;  %v1365_v19 = vld [vmem:[%s5276_s11 + $0x248] sm:$0xff] }
 0x4ad   :  { %v1461_v22 = vld [vmem:[%s5276_s11 + $0x548] sm:$0xff]  ;;  %1691 = vmatprep.subr.mxu0 %v1365_v19 }
 0x4ae   :  { %v1167_v14 = vmul.f32 %v1165_v34, %v1157_v6  ;;  %v1473_v6 = vld [vmem:[%s5276_s11 + $0x5a8] sm:$0xff] }
 0x4b0   :  { %v1168_v26 = vsub.f32 %v1166_v23, %v1167_v14  ;;  %v1460_v23 = vld [vmem:[%s5276_s11 + $0x540] sm:$0xff]  ;;  %v1362_v14 = vld [vmem:[%s5276_s11 + $0x230] sm:$0xff] }
 0x4b2   :  { %v1173_v27 = vrot.slane %v1168_v26, %v3726_v2  ;;  %v1458_v26 = vld [vmem:[%s5276_s11 + $0x530] sm:$0xff] }
 0x4b4   :  { %v1175_v18 = vsel %vm626_vm6, %v1165_v34, %v1173_v27  ;;  %v1364_v34 = vld [vmem:[%s5276_s11 + $0x240] sm:$0xff]  ;;  %v1361_v27 = vld [vmem:[%s5276_s11 + $0x228] sm:$0xff] }
 0x4b5   :  { %3122 = vmatmul.mubr.msk.f32.vlgmr.msra.gmra.mxu1 %vm1130_vm11, %v1175_v18  ;;  %1692 = vmatpush2.msra.mxu0 %v1364_v34  ;;  %v1359_v18 = vld [vmem:[%s5276_s11 + $0x218] sm:$0xff] }
 0x4b6   :  { %1717 = vmatpush1.msra.mxu1 %v1433_v47  ;;  %1693 = vmatprep.subr.mxu0 %v1362_v14  ;;  %v1457_v47 = vld [vmem:[%s5276_s11 + $0x528] sm:$0xff]  ;;  %v1623_v14 = vld [vmem:[%s5276_s11 + $0xa58] sm:$0xff] }
 0x4b7   :  { %1718 = vmatprep.subr.mxu1 %v1431_v30  ;;  %1694 = vmatpush2.msra.mxu0 %v1361_v27  ;;  %v1455_v30 = vld [vmem:[%s5276_s11 + $0x518] sm:$0xff] }
 0x4b8   :  { %1719 = vmatpush1.msra.mxu1 %v1430_v60  ;;  %1695 = vmatprep.subr.mxu0 %v1359_v18  ;;  %v1358_v60 = vld [vmem:[%s5276_s11 + $0x210] sm:$0xff]  ;;  %v1524_v18 = vld [vmem:[%s5276_s11 + $0x740] sm:$0xff] }
 0x4b9   :  { %1720 = vmatprep.subr.mxu1 %v1428_v21  ;;  %v1454_v21 = vld [vmem:[%s5276_s11 + $0x510] sm:$0xff]  ;;  %1696 = vmatpush2.msra.mxu0 %v1358_v60  ;;  %v1523_v60 = vld [vmem:[%s5276_s11 + $0x738] sm:$0xff] }
 0x4ba   :  { %1721 = vmatpush1.msra.mxu1 %v1427_v24  ;;  %v1356_v24 = vld [vmem:[%s5276_s11 + $0x200] sm:$0xff] }
 0x4bb   :  { %1722 = vmatprep.subr.mxu1 %v1425_v32  ;;  %v1452_v32 = vld [vmem:[%s5276_s11 + $0x500] sm:$0xff]  ;;  %1697 = vmatprep.subr.mxu0 %v1356_v24  ;;  %v1521_v24 = vld [vmem:[%s5276_s11 + $0x728] sm:$0xff] }
 0x4bc   :  { %1723 = vmatpush1.msra.mxu1 %v1424_v35  ;;  %v1355_v35 = vld [vmem:[%s5276_s11 + $0x1f8] sm:$0xff] }
 0x4bd   :  { %1724 = vmatprep.subr.mxu1 %v1422_v52  ;;  %v1451_v52 = vld [vmem:[%s5276_s11 + $0x4f8] sm:$0xff]  ;;  %1698 = vmatpush2.msra.mxu0 %v1355_v35  ;;  %v1520_v35 = vld [vmem:[%s5276_s11 + $0x720] sm:$0xff] }
 0x4be   :  { %1725 = vmatpush1.msra.mxu1 %v1421_v38  ;;  %v1353_v38 = vld [vmem:[%s5276_s11 + $0x1e8] sm:$0xff] }
 0x4bf   :  { %1726 = vmatprep.subr.mxu1 %v1419_v37  ;;  %v1449_v37 = vld [vmem:[%s5276_s11 + $0x4e8] sm:$0xff]  ;;  %1699 = vmatprep.subr.mxu0 %v1353_v38  ;;  %v1518_v38 = vld [vmem:[%s5276_s11 + $0x710] sm:$0xff] }
 0x4c0   :  { %1727 = vmatpush1.msra.mxu1 %v1418_v39  ;;  %v1352_v39 = vld [vmem:[%s5276_s11 + $0x1e0] sm:$0xff] }
 0x4c1   :  { %1728 = vmatprep.subr.mxu1 %v1416_v1  ;;  %v1448_v1 = vld [vmem:[%s5276_s11 + $0x4e0] sm:$0xff]  ;;  %1700 = vmatpush2.msra.mxu0 %v1352_v39  ;;  %v1517_v39 = vld [vmem:[%s5276_s11 + $0x708] sm:$0xff] }
 0x4c2   :  { %1729 = vmatpush1.msra.mxu1 %v1415_v12  ;;  %v1350_v12 = vld [vmem:[%s5276_s11 + $0x1d0] sm:$0xff] }
 0x4c3   :  { %1730 = vmatprep.subr.mxu1 %v1413_v41  ;;  %v1446_v41 = vld [vmem:[%s5276_s11 + $0x4d0] sm:$0xff]  ;;  %1701 = vmatprep.subr.mxu0 %v1350_v12  ;;  %v1515_v12 = vld [vmem:[%s5276_s11 + $0x6f8] sm:$0xff] }
 0x4c4   :  { %1731 = vmatpush1.msra.mxu1 %v1412_v42  ;;  %v1349_v42 = vld [vmem:[%s5276_s11 + $0x1c8] sm:$0xff] }
 0x4c5   :  { %1732 = vmatprep.subr.mxu1 %v1410_v29  ;;  %v1445_v29 = vld [vmem:[%s5276_s11 + $0x4c8] sm:$0xff]  ;;  %1702 = vmatpush2.msra.mxu0 %v1349_v42  ;;  %v1514_v42 = vld [vmem:[%s5276_s11 + $0x6f0] sm:$0xff] }
 0x4c6   :  { %1733 = vmatpush1.msra.mxu1 %v1409_v43  ;;  %v1347_v43 = vld [vmem:[%s5276_s11 + $0x1b8] sm:$0xff] }
 0x4c7   :  { %1734 = vmatprep.subr.mxu1 %v1407_v44  ;;  %v1443_v44 = vld [vmem:[%s5276_s11 + $0x4b8] sm:$0xff]  ;;  %1703 = vmatprep.subr.mxu0 %v1347_v43  ;;  %v1512_v43 = vld [vmem:[%s5276_s11 + $0x6e0] sm:$0xff] }
 0x4c8   :  { %1735 = vmatpush1.msra.mxu1 %v1406_v45  ;;  %v1346_v45 = vld [vmem:[%s5276_s11 + $0x1b0] sm:$0xff] }
 0x4c9   :  { %1736 = vmatprep.subr.mxu1 %v1404_v46  ;;  %v1442_v46 = vld [vmem:[%s5276_s11 + $0x4b0] sm:$0xff]  ;;  %1704 = vmatpush2.msra.mxu0 %v1346_v45  ;;  %v1511_v45 = vld [vmem:[%s5276_s11 + $0x6d8] sm:$0xff] }
 0x4ca   :  { %1737 = vmatpush1.msra.mxu1 %v1403_v48  ;;  %v1344_v48 = vld [vmem:[%s5276_s11 + $0x1a0] sm:$0xff] }
 0x4cb   :  { %1738 = vmatprep.subr.mxu1 %v1401_v49  ;;  %v1440_v49 = vld [vmem:[%s5276_s11 + $0x4a0] sm:$0xff]  ;;  %1705 = vmatprep.subr.mxu0 %v1344_v48  ;;  %v1509_v48 = vld [vmem:[%s5276_s11 + $0x6c8] sm:$0xff] }
 0x4cc   :  { %1739 = vmatpush1.msra.mxu1 %v1400_v50  ;;  %v1343_v50 = vld [vmem:[%s5276_s11 + $0x198] sm:$0xff] }
 0x4cd   :  { %1740 = vmatprep.subr.mxu1 %v1398_v51  ;;  %v1439_v51 = vld [vmem:[%s5276_s11 + $0x498] sm:$0xff]  ;;  %1706 = vmatpush2.msra.mxu0 %v1343_v50  ;;  %v1508_v50 = vld [vmem:[%s5276_s11 + $0x6c0] sm:$0xff] }
 0x4ce   :  { %1741 = vmatpush1.msra.mxu1 %v1397_v53  ;;  %v1341_v53 = vld [vmem:[%s5276_s11 + $0x188] sm:$0xff] }
 0x4cf   :  { %1742 = vmatprep.subr.mxu1 %v1395_v54  ;;  %v1437_v54 = vld [vmem:[%s5276_s11 + $0x488] sm:$0xff]  ;;  %1707 = vmatprep.subr.mxu0 %v1341_v53  ;;  %v1506_v53 = vld [vmem:[%s5276_s11 + $0x6b0] sm:$0xff] }
 0x4d0   :  { %1743 = vmatpush1.msra.mxu1 %v1394_v55  ;;  %v1340_v55 = vld [vmem:[%s5276_s11 + $0x180] sm:$0xff] }
 0x4d1   :  { %1744 = vmatprep.subr.mxu1 %v1392_v56  ;;  %v1436_v56 = vld [vmem:[%s5276_s11 + $0x480] sm:$0xff]  ;;  %1708 = vmatpush2.msra.mxu0 %v1340_v55  ;;  %v1505_v55 = vld [vmem:[%s5276_s11 + $0x6a8] sm:$0xff] }
 0x4d2   :  { %1745 = vmatpush1.msra.mxu1 %v1391_v57  ;;  %v1530_v57 = vld [vmem:[%s5276_s11 + $0x770] sm:$0xff] }
 0x4d3   :  { %1746 = vmatprep.subr.mxu1 %v1389_v58  ;;  %v1626_v58 = vld [vmem:[%s5276_s11 + $0xa70] sm:$0xff]  ;;  %1787 = vmatprep.subr.mxu0 %v1530_v57  ;;  %v1503_v57 = vld [vmem:[%s5276_s11 + $0x698] sm:$0xff] }
 0x4d4   :  { %1747 = vmatpush1.msra.mxu1 %v1388_v59 }
 0x4d5   :  { %1748 = vmatprep.subr.mxu1 %v1482_v61 }
 0x4d6   :  { %1749 = vmatpush2.msra.mxu1 %v1481_v63 }
 0x4d7   :  { %1750 = vmatprep.subr.mxu1 %v1479_v0 }
 0x4d8   :  { %1751 = vmatpush2.msra.mxu1 %v1478_v3 }
 0x4d9   :  { %1752 = vmatprep.subr.mxu1 %v1476_v4 }
 0x4da   :  { %1753 = vmatpush2.msra.mxu1 %v1475_v5 }
 0x4db   :  { %1754 = vmatprep.subr.mxu1 %v1473_v6 }
 0x4dc   :  { %1755 = vmatpush2.msra.mxu1 %v1472_v7 }
 0x4dd   :  { %1756 = vmatprep.subr.mxu1 %v1470_v10 }
 0x4de   :  { %1757 = vmatpush2.msra.mxu1 %v1469_v11 }
 0x4df   :  { %1758 = vmatprep.subr.mxu1 %v1467_v13 }
 0x4e0   :  { %1759 = vmatpush2.msra.mxu1 %v1466_v15 }
 0x4e1   :  { %1760 = vmatprep.subr.mxu1 %v1464_v16 }
 0x4e2   :  { %1761 = vmatpush2.msra.mxu1 %v1463_v17 }
 0x4e3   :  { %1762 = vmatprep.subr.mxu1 %v1461_v22 }
 0x4e4   :  { %1763 = vmatpush2.msra.mxu1 %v1460_v23 }
 0x4e5   :  { %1764 = vmatprep.subr.mxu1 %v1458_v26  ;;  %v1526_v26 = vld [vmem:[%s5276_s11 + $0x750] sm:$0xff] }
 0x4e6   :  { %1765 = vmatpush2.msra.mxu1 %v1457_v47  ;;  %v1622_v47 = vld [vmem:[%s5276_s11 + $0xa50] sm:$0xff] }
 0x4e7   :  { %1766 = vmatprep.subr.mxu1 %v1455_v30  ;;  %v1620_v30 = vld [vmem:[%s5276_s11 + $0xa40] sm:$0xff] }
 0x4e8   :  { %1767 = vmatpush2.msra.mxu1 %v1454_v21  ;;  %v1619_v21 = vld [vmem:[%s5276_s11 + $0xa38] sm:$0xff] }
 0x4e9   :  { %1768 = vmatprep.subr.mxu1 %v1452_v32  ;;  %v1617_v32 = vld [vmem:[%s5276_s11 + $0xa28] sm:$0xff] }
 0x4ea   :  { %1769 = vmatpush2.msra.mxu1 %v1451_v52  ;;  %v1616_v52 = vld [vmem:[%s5276_s11 + $0xa20] sm:$0xff] }
 0x4eb   :  { %1770 = vmatprep.subr.mxu1 %v1449_v37  ;;  %v1614_v37 = vld [vmem:[%s5276_s11 + $0xa10] sm:$0xff] }
 0x4ec   :  { %1771 = vmatpush2.msra.mxu1 %v1448_v1  ;;  %v1613_v1 = vld [vmem:[%s5276_s11 + $0xa08] sm:$0xff] }
 0x4ed   :  { %1772 = vmatprep.subr.mxu1 %v1446_v41  ;;  %v1611_v41 = vld [vmem:[%s5276_s11 + $0x9f8] sm:$0xff] }
 0x4ee   :  { %1773 = vmatpush2.msra.mxu1 %v1445_v29  ;;  %v1610_v29 = vld [vmem:[%s5276_s11 + $0x9f0] sm:$0xff] }
 0x4ef   :  { %1774 = vmatprep.subr.mxu1 %v1443_v44  ;;  %v1608_v44 = vld [vmem:[%s5276_s11 + $0x9e0] sm:$0xff] }
 0x4f0   :  { %1775 = vmatpush2.msra.mxu1 %v1442_v46  ;;  %v1607_v46 = vld [vmem:[%s5276_s11 + $0x9d8] sm:$0xff] }
 0x4f1   :  { %1776 = vmatprep.subr.mxu1 %v1440_v49  ;;  %v1605_v49 = vld [vmem:[%s5276_s11 + $0x9c8] sm:$0xff] }
 0x4f2   :  { %1777 = vmatpush2.msra.mxu1 %v1439_v51  ;;  %v1604_v51 = vld [vmem:[%s5276_s11 + $0x9c0] sm:$0xff] }
 0x4f3   :  { %1778 = vmatprep.subr.mxu1 %v1437_v54  ;;  %v1602_v54 = vld [vmem:[%s5276_s11 + $0x9b0] sm:$0xff] }
 0x4f4   :  { %1779 = vmatpush2.msra.mxu1 %v1436_v56  ;;  %v1601_v56 = vld [vmem:[%s5276_s11 + $0x9a8] sm:$0xff] }
 0x4f5   :  { %1858 = vmatprep.subr.mxu1 %v1626_v58  ;;  %v1599_v58 = vld [vmem:[%s5276_s11 + $0x998] sm:$0xff] }
 0x575   :  { %v1247_v59 = vpop.f32.mrf.mxu1 }
 0x576   :  { %v1254_v61 = vrot.slane %v1247_v59, %v3726_v2  ;;  %v1262_v63 = vrot.slane %v1247_v59, %v3855_v62  ;;  %v1502_v59 = vld [vmem:[%s5276_s11 + $0x690] sm:$0xff] }
 0x577   :  { %v3123_v0 = vpop.f32.mrf.mxu1 }
 0x578   :  { %v1255_v3 = vmul.f32 %v1254_v61, %v3943_v31  ;;  %v1256_v4 = vmul.f32 %v1254_v61, %v3955_v40  ;;  %v1257_v5 = vmul.f32 %v1254_v61, %v3961_v33  ;;  %v1258_v6 = vmul.f32 %v1254_v61, %v3969_v36  ;;  %v1529_v36 = vld [vmem:[%s5276_s11 + $0x768] sm:$0xff]  ;;  %v1598_v61 = vld [vmem:[%s5276_s11 + $0x990] sm:$0xff]  ;;  %v1596_v0 = vld [vmem:[%s5276_s11 + $0x980] sm:$0xff] }
 0x57a   :  { %v1263_v7 = vadd.f32 %v1262_v63, %v1255_v3  ;;  %v1264_v10 = vadd.f32 %v1262_v63, %v1256_v4  ;;  %v1265_v11 = vadd.f32 %v1262_v63, %v1257_v5  ;;  %v1266_v13 = vadd.f32 %v1262_v63, %v1258_v6  ;;  %v1500_v63 = vld [vmem:[%s5276_s11 + $0x680] sm:$0xff]  ;;  %v1499_v3 = vld [vmem:[%s5276_s11 + $0x678] sm:$0xff]  ;;  %v1497_v5 = vld [vmem:[%s5276_s11 + $0x668] sm:$0xff] }
 0x57b   :  { %v1595_v4 = vld [vmem:[%s5276_s11 + $0x978] sm:$0xff]  ;;  %v1593_v6 = vld [vmem:[%s5276_s11 + $0x968] sm:$0xff] }
 0x57c   :  { %v1267_v15 = vmax.f32 %v1263_v7, 0.0  ;;  %v1268_v16 = vmax.f32 %v1264_v10, 0.0  ;;  %v1269_v17 = vmax.f32 %v1265_v11, 0.0  ;;  %v1270_v19 = vmax.f32 %v1266_v13, 0.0  ;;  %v1496_v7 = vld [vmem:[%s5276_s11 + $0x660] sm:$0xff]  ;;  %v1494_v11 = vld [vmem:[%s5276_s11 + $0x650] sm:$0xff] }
 0x57d   :  { %v1592_v10 = vld [vmem:[%s5276_s11 + $0x960] sm:$0xff]  ;;  %v1590_v13 = vld [vmem:[%s5276_s11 + $0x950] sm:$0xff] }
 0x57e   :  { %v1271_v22 = vsel %vm3922_vm7, %v1267_v15, 0.0  ;;  %v1272_v31 = vsel %vm3930_vm8, %v1268_v16, 0.0  ;;  %v1273_v40 = vsel %vm3936_vm9, %v1269_v17, 0.0  ;;  %v1274_v33 = vsel %vm3947_vm10, %v1270_v19, 0.0  ;;  %v1493_v15 = vld [vmem:[%s5276_s11 + $0x648] sm:$0xff]  ;;  %v1491_v17 = vld [vmem:[%s5276_s11 + $0x638] sm:$0xff] }
 0x57f   :  { %1275 = vst [vmem:[#allocation3] sm:$0xff] %v1271_v22  ;;  %1276 = vst [vmem:[#allocation3 + $0x8] sm:$0xff] %v1272_v31  ;;  %v1589_v16 = vld [vmem:[%s5276_s11 + $0x948] sm:$0xff]  ;;  %v1587_v19 = vld [vmem:[%s5276_s11 + $0x938] sm:$0xff] }
 0x580   :  { %1277 = vst [vmem:[#allocation3 + $0x10] sm:$0xff] %v1273_v40  ;;  %1278 = vst [vmem:[#allocation3 + $0x18] sm:$0xff] %v1274_v33  ;;  %v1490_v22 = vld [vmem:[%s5276_s11 + $0x630] sm:$0xff]  ;;  %v1488_v40 = vld [vmem:[%s5276_s11 + $0x620] sm:$0xff] }
 0x581   :  { %v1586_v31 = vld [vmem:[%s5276_s11 + $0x930] sm:$0xff]  ;;  %v1584_v33 = vld [vmem:[%s5276_s11 + $0x920] sm:$0xff] }
 0x587   :  { %v4412_v28 = vld [vmem:[#allocation3 + $0x1] ss:$8 sm:$0xf]  ;;  %v4414_v9 = vld [vmem:[#allocation3 + $0x3] ss:$8 sm:$0xf] }
 0x588   :  { %1709 = vmatprep.mubr.f32.mxu0 %v4412_v28  ;;  %1780 = vmatprep.mubr.f32.mxu1 %v4414_v9  ;;  %v4418_v34 = vld [vmem:[#allocation3] ss:$8 sm:$0xf]  ;;  %v4420_v23 = vld [vmem:[#allocation3 + $0x2] ss:$8 sm:$0xf] }
 0x589   :  { %1710 = vmatmul.mubr.f32.vlgmr.msra.gmra.mxu0 %v4418_v34  ;;  %1781 = vmatmul.mubr.f32.vlgmr.msra.gmra.mxu1 %v4420_v23  ;;  %v4430_v27 = vld [vmem:[#allocation3 + $0x5] ss:$8 sm:$0xf] }
 0x58a   :  { %1788 = vmatpush1.msra.mxu0 %v1529_v36  ;;  %1859 = vmatpush1.msra.mxu1 %v1625_v8  ;;  %v1487_v36 = vld [vmem:[%s5276_s11 + $0x618] sm:$0xff] }
 0x58b   :  { %1789 = vmatprep.subr.mxu0 %v1527_v20  ;;  %1851 = vmatprep.mubr.f32.mxu0 %v4430_v27  ;;  %v1583_v8 = vld [vmem:[%s5276_s11 + $0x918] sm:$0xff]  ;;  %v1485_v20 = vld [vmem:[%s5276_s11 + $0x608] sm:$0xff] }
 0x58c   :  { %1860 = vmatprep.subr.mxu1 %v1623_v14  ;;  %1790 = vmatpush1.msra.mxu0 %v1526_v26  ;;  %v1581_v14 = vld [vmem:[%s5276_s11 + $0x908] sm:$0xff]  ;;  %v1484_v26 = vld [vmem:[%s5276_s11 + $0x600] sm:$0xff] }
 0x58d   :  { %1861 = vmatpush1.msra.mxu1 %v1622_v47  ;;  %1791 = vmatprep.subr.mxu0 %v1524_v18  ;;  %v1580_v47 = vld [vmem:[%s5276_s11 + $0x900] sm:$0xff]  ;;  %v1578_v18 = vld [vmem:[%s5276_s11 + $0x8f0] sm:$0xff] }
 0x58e   :  { %1862 = vmatprep.subr.mxu1 %v1620_v30  ;;  %1792 = vmatpush1.msra.mxu0 %v1523_v60  ;;  %v1387_v30 = vld [vmem:[%s5276_s11 + $0x2f8] sm:$0xff]  ;;  %v1577_v60 = vld [vmem:[%s5276_s11 + $0x8e8] sm:$0xff] }
 0x58f   :  { %1863 = vmatpush1.msra.mxu1 %v1619_v21  ;;  %1793 = vmatprep.subr.mxu0 %v1521_v24  ;;  %v4613_v21 = vld [vmem:[#allocation2] sm:$0xff] }
 0x590   :  { %1864 = vmatprep.subr.mxu1 %v1617_v32  ;;  %1794 = vmatpush1.msra.mxu0 %v1520_v35  ;;  %v4616_v24 = vld [vmem:[#allocation3 + $0x6] ss:$8 sm:$0xf] }
 0x591   :  { %1865 = vmatpush1.msra.mxu1 %v1616_v52  ;;  %1795 = vmatprep.subr.mxu0 %v1518_v38  ;;  %v1339_v32 = vld [vmem:[%s5276_s11 + $0x178] sm:$0xff]  ;;  %v1384_v52 = vld [vmem:[%s5276_s11 + $0x2e0] sm:$0xff]  ;;  %v1574_v38 = vld [vmem:[%s5276_s11 + $0x8d0] sm:$0xff] }
 0x592   :  { %1866 = vmatprep.subr.mxu1 %v1614_v37  ;;  %1796 = vmatpush1.msra.mxu0 %v1517_v39  ;;  %v1575_v35 = vld [vmem:[%s5276_s11 + $0x8d8] sm:$0xff]  ;;  %v1336_v37 = vld [vmem:[%s5276_s11 + $0x160] sm:$0xff] }
 0x593   :  { %1867 = vmatpush1.msra.mxu1 %v1613_v1  ;;  %1797 = vmatprep.subr.mxu0 %v1515_v12  ;;  %v1572_v39 = vld [vmem:[%s5276_s11 + $0x8c0] sm:$0xff]  ;;  %v1381_v1 = vld [vmem:[%s5276_s11 + $0x2c8] sm:$0xff]  ;;  %v1571_v12 = vld [vmem:[%s5276_s11 + $0x8b8] sm:$0xff] }
 0x594   :  { %1868 = vmatprep.subr.mxu1 %v1611_v41  ;;  %1798 = vmatpush1.msra.mxu0 %v1514_v42  ;;  %v1333_v41 = vld [vmem:[%s5276_s11 + $0x148] sm:$0xff]  ;;  %v1378_v42 = vld [vmem:[%s5276_s11 + $0x2b0] sm:$0xff] }
 0x595   :  { %1869 = vmatpush1.msra.mxu1 %v1610_v29  ;;  %1799 = vmatprep.subr.mxu0 %v1512_v43  ;;  %v1568_v29 = vld [vmem:[%s5276_s11 + $0x8a0] sm:$0xff]  ;;  %v1330_v43 = vld [vmem:[%s5276_s11 + $0x130] sm:$0xff] }
 0x596   :  { %1870 = vmatprep.subr.mxu1 %v1608_v44  ;;  %1800 = vmatpush1.msra.mxu0 %v1511_v45  ;;  %v1566_v44 = vld [vmem:[%s5276_s11 + $0x890] sm:$0xff]  ;;  %v1375_v45 = vld [vmem:[%s5276_s11 + $0x298] sm:$0xff] }
 0x597   :  { %1871 = vmatpush1.msra.mxu1 %v1607_v46  ;;  %1801 = vmatprep.subr.mxu0 %v1509_v48  ;;  %v1565_v46 = vld [vmem:[%s5276_s11 + $0x888] sm:$0xff]  ;;  %v1327_v48 = vld [vmem:[%s5276_s11 + $0x118] sm:$0xff] }
 0x598   :  { %1872 = vmatprep.subr.mxu1 %v1605_v49  ;;  %1802 = vmatpush1.msra.mxu0 %v1508_v50  ;;  %v1563_v49 = vld [vmem:[%s5276_s11 + $0x878] sm:$0xff]  ;;  %v1372_v50 = vld [vmem:[%s5276_s11 + $0x280] sm:$0xff] }
 0x599   :  { %1873 = vmatpush1.msra.mxu1 %v1604_v51  ;;  %1803 = vmatprep.subr.mxu0 %v1506_v53  ;;  %v1562_v51 = vld [vmem:[%s5276_s11 + $0x870] sm:$0xff]  ;;  %v1324_v53 = vld [vmem:[%s5276_s11 + $0x100] sm:$0xff] }
 0x59a   :  { %1874 = vmatprep.subr.mxu1 %v1602_v54  ;;  %1804 = vmatpush1.msra.mxu0 %v1505_v55  ;;  %v1560_v54 = vld [vmem:[%s5276_s11 + $0x860] sm:$0xff]  ;;  %v1369_v55 = vld [vmem:[%s5276_s11 + $0x268] sm:$0xff] }
 0x59b   :  { %1875 = vmatpush1.msra.mxu1 %v1601_v56  ;;  %1805 = vmatprep.subr.mxu0 %v1503_v57  ;;  %v1559_v56 = vld [vmem:[%s5276_s11 + $0x858] sm:$0xff]  ;;  %v1321_v57 = vld [vmem:[%s5276_s11 + $0xe8] sm:$0xff] }
 0x59c   :  { %1876 = vmatprep.subr.mxu1 %v1599_v58  ;;  %1806 = vmatpush1.msra.mxu0 %v1502_v59  ;;  %v1557_v58 = vld [vmem:[%s5276_s11 + $0x848] sm:$0xff]  ;;  %v1366_v59 = vld [vmem:[%s5276_s11 + $0x250] sm:$0xff] }
 0x59d   :  { %1877 = vmatpush1.msra.mxu1 %v1598_v61  ;;  %1807 = vmatprep.subr.mxu0 %v1500_v63  ;;  %v1556_v61 = vld [vmem:[%s5276_s11 + $0x840] sm:$0xff]  ;;  %v1318_v63 = vld [vmem:[%s5276_s11 + $0xd0] sm:$0xff] }
 0x59e   :  { %1878 = vmatprep.subr.mxu1 %v1596_v0  ;;  %1808 = vmatpush1.msra.mxu0 %v1499_v3  ;;  %v1554_v0 = vld [vmem:[%s5276_s11 + $0x830] sm:$0xff]  ;;  %v1363_v3 = vld [vmem:[%s5276_s11 + $0x238] sm:$0xff] }
 0x59f   :  { %1879 = vmatpush1.msra.mxu1 %v1595_v4  ;;  %1809 = vmatprep.subr.mxu0 %v1497_v5  ;;  %v1553_v4 = vld [vmem:[%s5276_s11 + $0x828] sm:$0xff]  ;;  %v1315_v5 = vld [vmem:[%s5276_s11 + $0xb8] sm:$0xff] }
 0x5a0   :  { %1880 = vmatprep.subr.mxu1 %v1593_v6  ;;  %1810 = vmatpush1.msra.mxu0 %v1496_v7  ;;  %v1551_v6 = vld [vmem:[%s5276_s11 + $0x818] sm:$0xff]  ;;  %v1360_v7 = vld [vmem:[%s5276_s11 + $0x220] sm:$0xff] }
 0x5a1   :  { %1881 = vmatpush1.msra.mxu1 %v1592_v10  ;;  %1811 = vmatprep.subr.mxu0 %v1494_v11  ;;  %v1550_v10 = vld [vmem:[%s5276_s11 + $0x810] sm:$0xff]  ;;  %v1312_v11 = vld [vmem:[%s5276_s11 + $0xa0] sm:$0xff] }
 0x5a2   :  { %1882 = vmatprep.subr.mxu1 %v1590_v13  ;;  %1812 = vmatpush1.msra.mxu0 %v1493_v15  ;;  %v1548_v13 = vld [vmem:[%s5276_s11 + $0x800] sm:$0xff]  ;;  %v1357_v15 = vld [vmem:[%s5276_s11 + $0x208] sm:$0xff] }
 0x5a3   :  { %1883 = vmatpush1.msra.mxu1 %v1589_v16  ;;  %1813 = vmatprep.subr.mxu0 %v1491_v17  ;;  %v1547_v16 = vld [vmem:[%s5276_s11 + $0x7f8] sm:$0xff]  ;;  %v1309_v17 = vld [vmem:[%s5276_s11 + $0x88] sm:$0xff] }
 0x5a4   :  { %1884 = vmatprep.subr.mxu1 %v1587_v19  ;;  %1814 = vmatpush1.msra.mxu0 %v1490_v22  ;;  %v1545_v19 = vld [vmem:[%s5276_s11 + $0x7e8] sm:$0xff]  ;;  %v1354_v22 = vld [vmem:[%s5276_s11 + $0x1f0] sm:$0xff] }
 0x5a5   :  { %1885 = vmatpush1.msra.mxu1 %v1586_v31  ;;  %1815 = vmatprep.subr.mxu0 %v1488_v40  ;;  %v1544_v31 = vld [vmem:[%s5276_s11 + $0x7e0] sm:$0xff]  ;;  %v1306_v40 = vld [vmem:[%s5276_s11 + $0x70] sm:$0xff] }
 0x5a6   :  { %1886 = vmatprep.subr.mxu1 %v1584_v33  ;;  %1816 = vmatpush1.msra.mxu0 %v1487_v36  ;;  %v1542_v33 = vld [vmem:[%s5276_s11 + $0x7d0] sm:$0xff]  ;;  %v1351_v36 = vld [vmem:[%s5276_s11 + $0x1d8] sm:$0xff] }
 0x5a7   :  { %1887 = vmatpush1.msra.mxu1 %v1583_v8  ;;  %1817 = vmatprep.subr.mxu0 %v1485_v20  ;;  %v1541_v8 = vld [vmem:[%s5276_s11 + $0x7c8] sm:$0xff]  ;;  %v1303_v20 = vld [vmem:[%s5276_s11 + $0x58] sm:$0xff] }
 0x5a8   :  { %1888 = vmatprep.subr.mxu1 %v1581_v14  ;;  %1818 = vmatpush1.msra.mxu0 %v1484_v26  ;;  %v1539_v14 = vld [vmem:[%s5276_s11 + $0x7b8] sm:$0xff]  ;;  %v1348_v26 = vld [vmem:[%s5276_s11 + $0x1c0] sm:$0xff] }
 0x5a9   :  { %1889 = vmatpush1.msra.mxu1 %v1580_v47  ;;  %1922 = vmatprep.mubr.f32.mxu1 %v4613_v21  ;;  %v1538_v47 = vld [vmem:[%s5276_s11 + $0x7b0] sm:$0xff] }
 0x5aa   :  { %1819 = vmatprep.subr.mxu0 %v1578_v18  ;;  %1923 = vmatmul.mubr.f32.vlgmr.msra.gmra.mxu1 %v4616_v24  ;;  %v1300_v18 = vld [vmem:[%s5276_s11 + $0x40] sm:$0xff] }
 0x5ab   :  { %2751 = vmatprep.subr.mxu1 %v1387_v30  ;;  %1820 = vmatpush2.msra.mxu0 %v1577_v60  ;;  %v1536_v30 = vld [vmem:[%s5276_s11 + $0x7a0] sm:$0xff]  ;;  %v1345_v60 = vld [vmem:[%s5276_s11 + $0x1a8] sm:$0xff] }
 0x5ac   :  { %2752 = vmatpush3.msra.mxu1 %v1339_v32  ;;  %1993 = vmatprep.mubr.f32.mxu1 %v4412_v28  ;;  %v1569_v28 = vld [vmem:[%s5276_s11 + $0x8a8] sm:$0xff]  ;;  %v1535_v32 = vld [vmem:[%s5276_s11 + $0x798] sm:$0xff] }
 0x5ad   :  { %1821 = vmatprep.subr.mxu0 %v1575_v35  ;;  %2753 = vmatprep.subr.mxu1 %v1384_v52  ;;  %v1297_v35 = vld [vmem:[%s5276_s11 + $0x28] sm:$0xff] }
 0x5ae   :  { %1822 = vmatpush2.msra.mxu0 %v1574_v38  ;;  %2754 = vmatpush3.msra.mxu1 %v1336_v37  ;;  %v1533_v52 = vld [vmem:[%s5276_s11 + $0x788] sm:$0xff]  ;;  %v1342_v38 = vld [vmem:[%s5276_s11 + $0x190] sm:$0xff]  ;;  %v1532_v37 = vld [vmem:[%s5276_s11 + $0x780] sm:$0xff] }
 0x5af   :  { %1823 = vmatprep.subr.mxu0 %v1572_v39  ;;  %2755 = vmatprep.subr.mxu1 %v1381_v1  ;;  %v1294_v39 = vld [vmem:[%s5276_s11 + $0x10] sm:$0xff]  ;;  %v1483_v1 = vld [vmem:[%s5276_s11 + $0x5f8] sm:$0xff] }
 0x5b0   :  { %1824 = vmatpush2.msra.mxu0 %v1571_v12  ;;  %2756 = vmatpush3.msra.mxu1 %v1333_v41  ;;  %v1579_v12 = vld [vmem:[%s5276_s11 + $0x8f8] sm:$0xff] }
 0x5b1   :  { %1825 = vmatprep.subr.mxu0 %v1569_v28  ;;  %2757 = vmatprep.subr.mxu1 %v1378_v42  ;;  %v4809_v41 = vld [vmem:[#allocation3 + $0x4] ss:$8 sm:$0xf] }
 0x5b2   :  { %1826 = vmatpush2.msra.mxu0 %v1568_v29  ;;  %2758 = vmatpush3.msra.mxu1 %v1330_v43  ;;  %v1435_v28 = vld [vmem:[%s5276_s11 + $0x478] sm:$0xff]  ;;  %v1480_v29 = vld [vmem:[%s5276_s11 + $0x5e0] sm:$0xff] }
 0x5b3   :  { %1827 = vmatprep.subr.mxu0 %v1566_v44  ;;  %2759 = vmatprep.subr.mxu1 %v1375_v45  ;;  %v1531_v42 = vld [vmem:[%s5276_s11 + $0x778] sm:$0xff]  ;;  %v1576_v43 = vld [vmem:[%s5276_s11 + $0x8e0] sm:$0xff]  ;;  %v1477_v45 = vld [vmem:[%s5276_s11 + $0x5c8] sm:$0xff] }
 0x5b4   :  { %1828 = vmatpush2.msra.mxu0 %v1565_v46  ;;  %2760 = vmatpush3.msra.mxu1 %v1327_v48  ;;  %v1528_v44 = vld [vmem:[%s5276_s11 + $0x760] sm:$0xff]  ;;  %v1573_v46 = vld [vmem:[%s5276_s11 + $0x8c8] sm:$0xff] }
 0x5b5   :  { %1829 = vmatprep.subr.mxu0 %v1563_v49  ;;  %2761 = vmatprep.subr.mxu1 %v1372_v50  ;;  %v1525_v48 = vld [vmem:[%s5276_s11 + $0x748] sm:$0xff]  ;;  %v1570_v49 = vld [vmem:[%s5276_s11 + $0x8b0] sm:$0xff] }
 0x5b6   :  { %1830 = vmatpush2.msra.mxu0 %v1562_v51  ;;  %2762 = vmatpush3.msra.mxu1 %v1324_v53  ;;  %v1426_v50 = vld [vmem:[%s5276_s11 + $0x430] sm:$0xff]  ;;  %v1471_v53 = vld [vmem:[%s5276_s11 + $0x598] sm:$0xff] }
 0x5b7   :  { %1831 = vmatprep.subr.mxu0 %v1560_v54  ;;  %2763 = vmatprep.subr.mxu1 %v1369_v55  ;;  %v1522_v51 = vld [vmem:[%s5276_s11 + $0x730] sm:$0xff]  ;;  %v1567_v54 = vld [vmem:[%s5276_s11 + $0x898] sm:$0xff] }
 0x5b8   :  { %1832 = vmatpush2.msra.mxu0 %v1559_v56  ;;  %2764 = vmatpush3.msra.mxu1 %v1321_v57  ;;  %v1423_v55 = vld [vmem:[%s5276_s11 + $0x418] sm:$0xff]  ;;  %v1468_v57 = vld [vmem:[%s5276_s11 + $0x580] sm:$0xff] }
 0x5b9   :  { %1833 = vmatprep.subr.mxu0 %v1557_v58  ;;  %2765 = vmatprep.subr.mxu1 %v1366_v59  ;;  %v1519_v56 = vld [vmem:[%s5276_s11 + $0x718] sm:$0xff]  ;;  %v1564_v58 = vld [vmem:[%s5276_s11 + $0x880] sm:$0xff] }
 0x5ba   :  { %1834 = vmatpush2.msra.mxu0 %v1556_v61  ;;  %2766 = vmatpush3.msra.mxu1 %v1318_v63  ;;  %v1420_v59 = vld [vmem:[%s5276_s11 + $0x400] sm:$0xff]  ;;  %v1465_v63 = vld [vmem:[%s5276_s11 + $0x568] sm:$0xff] }
 0x5bb   :  { %1835 = vmatprep.subr.mxu0 %v1554_v0  ;;  %2767 = vmatprep.subr.mxu1 %v1363_v3  ;;  %v1516_v61 = vld [vmem:[%s5276_s11 + $0x700] sm:$0xff]  ;;  %v1561_v0 = vld [vmem:[%s5276_s11 + $0x868] sm:$0xff] }
 0x5bc   :  { %1836 = vmatpush2.msra.mxu0 %v1553_v4  ;;  %2768 = vmatpush3.msra.mxu1 %v1315_v5  ;;  %v1417_v3 = vld [vmem:[%s5276_s11 + $0x3e8] sm:$0xff]  ;;  %v1462_v5 = vld [vmem:[%s5276_s11 + $0x550] sm:$0xff] }
 0x5bd   :  { %1837 = vmatprep.subr.mxu0 %v1551_v6  ;;  %2769 = vmatprep.subr.mxu1 %v1360_v7  ;;  %v1513_v4 = vld [vmem:[%s5276_s11 + $0x6e8] sm:$0xff]  ;;  %v1558_v6 = vld [vmem:[%s5276_s11 + $0x850] sm:$0xff] }
 0x5be   :  { %1838 = vmatpush2.msra.mxu0 %v1550_v10  ;;  %2770 = vmatpush3.msra.mxu1 %v1312_v11  ;;  %v1414_v7 = vld [vmem:[%s5276_s11 + $0x3d0] sm:$0xff]  ;;  %v1459_v11 = vld [vmem:[%s5276_s11 + $0x538] sm:$0xff] }
 0x5bf   :  { %1839 = vmatprep.subr.mxu0 %v1548_v13  ;;  %2771 = vmatprep.subr.mxu1 %v1357_v15  ;;  %v1510_v10 = vld [vmem:[%s5276_s11 + $0x6d0] sm:$0xff]  ;;  %v1555_v13 = vld [vmem:[%s5276_s11 + $0x838] sm:$0xff] }
 0x5c0   :  { %1840 = vmatpush2.msra.mxu0 %v1547_v16  ;;  %2772 = vmatpush3.msra.mxu1 %v1309_v17  ;;  %v1411_v15 = vld [vmem:[%s5276_s11 + $0x3b8] sm:$0xff]  ;;  %v1456_v17 = vld [vmem:[%s5276_s11 + $0x520] sm:$0xff] }
 0x5c1   :  { %1841 = vmatprep.subr.mxu0 %v1545_v19  ;;  %2773 = vmatprep.subr.mxu1 %v1354_v22  ;;  %v1507_v16 = vld [vmem:[%s5276_s11 + $0x6b8] sm:$0xff]  ;;  %v1552_v19 = vld [vmem:[%s5276_s11 + $0x820] sm:$0xff] }
 0x5c2   :  { %1842 = vmatpush2.msra.mxu0 %v1544_v31  ;;  %2774 = vmatpush3.msra.mxu1 %v1306_v40  ;;  %v1408_v22 = vld [vmem:[%s5276_s11 + $0x3a0] sm:$0xff]  ;;  %v1453_v40 = vld [vmem:[%s5276_s11 + $0x508] sm:$0xff] }
 0x5c3   :  { %1843 = vmatprep.subr.mxu0 %v1542_v33  ;;  %2775 = vmatprep.subr.mxu1 %v1351_v36  ;;  %v1504_v31 = vld [vmem:[%s5276_s11 + $0x6a0] sm:$0xff]  ;;  %v1549_v33 = vld [vmem:[%s5276_s11 + $0x808] sm:$0xff] }
 0x5c4   :  { %1844 = vmatpush2.msra.mxu0 %v1541_v8  ;;  %2776 = vmatpush3.msra.mxu1 %v1303_v20  ;;  %v1405_v36 = vld [vmem:[%s5276_s11 + $0x388] sm:$0xff]  ;;  %v1450_v20 = vld [vmem:[%s5276_s11 + $0x4f0] sm:$0xff] }
 0x5c5   :  { %1845 = vmatprep.subr.mxu0 %v1539_v14  ;;  %2777 = vmatprep.subr.mxu1 %v1348_v26  ;;  %v1501_v8 = vld [vmem:[%s5276_s11 + $0x688] sm:$0xff]  ;;  %v1546_v14 = vld [vmem:[%s5276_s11 + $0x7f0] sm:$0xff] }
 0x5c6   :  { %1846 = vmatpush2.msra.mxu0 %v1538_v47  ;;  %2778 = vmatpush3.msra.mxu1 %v1300_v18  ;;  %v1402_v26 = vld [vmem:[%s5276_s11 + $0x370] sm:$0xff]  ;;  %v1447_v18 = vld [vmem:[%s5276_s11 + $0x4d8] sm:$0xff] }
 0x5c7   :  { %1847 = vmatprep.subr.mxu0 %v1536_v30  ;;  %2779 = vmatprep.subr.mxu1 %v1345_v60  ;;  %v1498_v47 = vld [vmem:[%s5276_s11 + $0x670] sm:$0xff]  ;;  %v1543_v30 = vld [vmem:[%s5276_s11 + $0x7d8] sm:$0xff] }
 0x5c8   :  { %1848 = vmatpush2.msra.mxu0 %v1535_v32  ;;  %2780 = vmatpush3.msra.mxu1 %v1297_v35  ;;  %v1399_v60 = vld [vmem:[%s5276_s11 + $0x358] sm:$0xff]  ;;  %v1444_v35 = vld [vmem:[%s5276_s11 + $0x4c0] sm:$0xff] }
 0x5c9   :  { %1849 = vmatprep.subr.mxu0 %v1533_v52  ;;  %2781 = vmatprep.subr.mxu1 %v1342_v38  ;;  %v1495_v32 = vld [vmem:[%s5276_s11 + $0x658] sm:$0xff]  ;;  %v1540_v52 = vld [vmem:[%s5276_s11 + $0x7c0] sm:$0xff] }
 0x5ca   :  { %1850 = vmatpush2.msra.mxu0 %v1532_v37  ;;  %2782 = vmatpush3.msra.mxu1 %v1294_v39  ;;  %v1396_v38 = vld [vmem:[%s5276_s11 + $0x340] sm:$0xff]  ;;  %v1441_v39 = vld [vmem:[%s5276_s11 + $0x4a8] sm:$0xff] }
 0x5cb   :  { %1852 = vmatmul.mubr.f32.vlgmr.msra.gmra.mxu0 %v4809_v41  ;;  %1994 = vmatmul.mubr.f32.vlgmr.msra.gmra.mxu1 %v4418_v34  ;;  %v1432_v34 = vld [vmem:[%s5276_s11 + $0x460] sm:$0xff] }
 0x5cc   :  { %2786 = vmatprep.subr.mxu0 %v1483_v1  ;;  %2821 = vmatprep.subr.mxu1 %v1579_v12  ;;  %v1492_v37 = vld [vmem:[%s5276_s11 + $0x640] sm:$0xff]  ;;  %v1537_v1 = vld [vmem:[%s5276_s11 + $0x7a8] sm:$0xff] }
 0x5cd   :  { %2787 = vmatpush3.msra.mxu0 %v1435_v28  ;;  %2063 = vmatprep.mubr.f32.mxu0 %v4414_v9  ;;  %v1429_v9 = vld [vmem:[%s5276_s11 + $0x448] sm:$0xff] }
 0x5ce   :  { %2822 = vmatpush3.msra.mxu1 %v1531_v42  ;;  %2133 = vmatprep.mubr.f32.mxu1 %v4430_v27  ;;  %v1474_v27 = vld [vmem:[%s5276_s11 + $0x5b0] sm:$0xff]  ;;  %v1393_v12 = vld [vmem:[%s5276_s11 + $0x328] sm:$0xff] }
 0x5cf   :  { %2788 = vmatprep.subr.mxu0 %v1480_v29  ;;  %2823 = vmatprep.subr.mxu1 %v1576_v43  ;;  %v1489_v28 = vld [vmem:[%s5276_s11 + $0x628] sm:$0xff]  ;;  %v1438_v42 = vld [vmem:[%s5276_s11 + $0x490] sm:$0xff] }
 0x5d0   :  { %2789 = vmatpush3.msra.mxu0 %v1432_v34  ;;  %2824 = vmatpush3.msra.mxu1 %v1528_v44  ;;  %v1534_v29 = vld [vmem:[%s5276_s11 + $0x790] sm:$0xff]  ;;  %v1627_v44 = vld [vmem:[%s5276_s11 + $0xa78] sm:$0xff] }
 0x5d1   :  { %2790 = vmatprep.subr.mxu0 %v1477_v45  ;;  %2825 = vmatprep.subr.mxu1 %v1573_v46  ;;  %v1390_v43 = vld [vmem:[%s5276_s11 + $0x310] sm:$0xff]  ;;  %v2243_v45 = vld [vmem:[%s5278_s13 + $0xf8] sm:$0xff] }
 0x5d2   :  { %2791 = vmatpush3.msra.mxu0 %v1429_v9  ;;  %2826 = vmatpush3.msra.mxu1 %v1525_v48  ;;  %v1486_v34 = vld [vmem:[%s5276_s11 + $0x610] sm:$0xff]  ;;  %v2227_v46 = vld [vmem:[%s5278_s13 + $0x78] sm:$0xff]  ;;  %v1624_v9 = vld [vmem:[%s5276_s11 + $0xa60] sm:$0xff] }
 0x5d3   :  { %2792 = vmatprep.subr.mxu0 %v1474_v27  ;;  %2827 = vmatprep.subr.mxu1 %v1570_v49  ;;  %v2242_v48 = vld [vmem:[%s5278_s13 + $0xf0] sm:$0xff]  ;;  %v2241_v27 = vld [vmem:[%s5278_s13 + $0xe8] sm:$0xff] }
 0x5d4   :  { %2793 = vmatpush3.msra.mxu0 %v1426_v50  ;;  %2828 = vmatpush3.msra.mxu1 %v1522_v51  ;;  %v2225_v49 = vld [vmem:[%s5278_s13 + $0x68] sm:$0xff]  ;;  %v1618_v50 = vld [vmem:[%s5276_s11 + $0xa30] sm:$0xff]  ;;  %v2240_v51 = vld [vmem:[%s5278_s13 + $0xe0] sm:$0xff] }
 0x5d5   :  { %2794 = vmatprep.subr.mxu0 %v1471_v53  ;;  %2829 = vmatprep.subr.mxu1 %v1567_v54  ;;  %v2224_v53 = vld [vmem:[%s5278_s13 + $0x60] sm:$0xff]  ;;  %v1615_v54 = vld [vmem:[%s5276_s11 + $0xa18] sm:$0xff] }
 0x5d6   :  { %2795 = vmatpush3.msra.mxu0 %v1423_v55  ;;  %2830 = vmatpush3.msra.mxu1 %v1519_v56  ;;  %v2239_v55 = vld [vmem:[%s5278_s13 + $0xd8] sm:$0xff] }
 0x5d7   :  { %2796 = vmatprep.subr.mxu0 %v1468_v57  ;;  %2831 = vmatprep.subr.mxu1 %v1564_v58  ;;  %v2223_v56 = vld [vmem:[%s5278_s13 + $0x58] sm:$0xff]  ;;  %v1612_v57 = vld [vmem:[%s5276_s11 + $0xa00] sm:$0xff]  ;;  %v2238_v58 = vld [vmem:[%s5278_s13 + $0xd0] sm:$0xff] }
 0x5d8   :  { %2797 = vmatpush3.msra.mxu0 %v1420_v59  ;;  %2832 = vmatpush3.msra.mxu1 %v1516_v61  ;;  %v2222_v59 = vld [vmem:[%s5278_s13 + $0x50] sm:$0xff]  ;;  %v1609_v61 = vld [vmem:[%s5276_s11 + $0x9e8] sm:$0xff] }
 0x5d9   :  { %2798 = vmatprep.subr.mxu0 %v1465_v63  ;;  %2833 = vmatprep.subr.mxu1 %v1561_v0  ;;  %v2237_v63 = vld [vmem:[%s5278_s13 + $0xc8] sm:$0xff] }
 0x5da   :  { %2799 = vmatpush3.msra.mxu0 %v1417_v3  ;;  %2834 = vmatpush3.msra.mxu1 %v1513_v4  ;;  %v2221_v0 = vld [vmem:[%s5278_s13 + $0x48] sm:$0xff]  ;;  %v1606_v3 = vld [vmem:[%s5276_s11 + $0x9d0] sm:$0xff]  ;;  %v2236_v4 = vld [vmem:[%s5278_s13 + $0xc0] sm:$0xff] }
 0x5db   :  { %2800 = vmatprep.subr.mxu0 %v1462_v5  ;;  %2835 = vmatprep.subr.mxu1 %v1558_v6  ;;  %v2220_v5 = vld [vmem:[%s5278_s13 + $0x40] sm:$0xff]  ;;  %v1603_v6 = vld [vmem:[%s5276_s11 + $0x9b8] sm:$0xff] }
 0x5dc   :  { %2801 = vmatpush3.msra.mxu0 %v1414_v7  ;;  %2836 = vmatpush3.msra.mxu1 %v1510_v10  ;;  %v2235_v7 = vld [vmem:[%s5278_s13 + $0xb8] sm:$0xff] }
 0x5dd   :  { %2802 = vmatprep.subr.mxu0 %v1459_v11  ;;  %2837 = vmatprep.subr.mxu1 %v1555_v13  ;;  %v2219_v10 = vld [vmem:[%s5278_s13 + $0x38] sm:$0xff]  ;;  %v1600_v11 = vld [vmem:[%s5276_s11 + $0x9a0] sm:$0xff]  ;;  %v2234_v13 = vld [vmem:[%s5278_s13 + $0xb0] sm:$0xff] }
 0x5de   :  { %2803 = vmatpush3.msra.mxu0 %v1411_v15  ;;  %2838 = vmatpush3.msra.mxu1 %v1507_v16  ;;  %v2218_v15 = vld [vmem:[%s5278_s13 + $0x30] sm:$0xff]  ;;  %v1597_v16 = vld [vmem:[%s5276_s11 + $0x988] sm:$0xff] }
 0x5df   :  { %2804 = vmatprep.subr.mxu0 %v1456_v17  ;;  %2839 = vmatprep.subr.mxu1 %v1552_v19  ;;  %v2233_v17 = vld [vmem:[%s5278_s13 + $0xa8] sm:$0xff] }
 0x5e0   :  { %2805 = vmatpush3.msra.mxu0 %v1408_v22  ;;  %2840 = vmatpush3.msra.mxu1 %v1504_v31  ;;  %v2217_v19 = vld [vmem:[%s5278_s13 + $0x28] sm:$0xff]  ;;  %v1594_v22 = vld [vmem:[%s5276_s11 + $0x970] sm:$0xff]  ;;  %v1591_v31 = vld [vmem:[%s5276_s11 + $0x958] sm:$0xff] }
 0x5e1   :  { %2806 = vmatprep.subr.mxu0 %v1453_v40  ;;  %2841 = vmatprep.subr.mxu1 %v1549_v33  ;;  %v1588_v40 = vld [vmem:[%s5276_s11 + $0x940] sm:$0xff]  ;;  %v1585_v33 = vld [vmem:[%s5276_s11 + $0x928] sm:$0xff] }
 0x5e2   :  { %2807 = vmatpush3.msra.mxu0 %v1405_v36  ;;  %2842 = vmatpush3.msra.mxu1 %v1501_v8  ;;  %v1582_v36 = vld [vmem:[%s5276_s11 + $0x910] sm:$0xff]  ;;  %v2232_v8 = vld [vmem:[%s5278_s13 + $0xa0] sm:$0xff] }
 0x5e3   :  { %2808 = vmatprep.subr.mxu0 %v1450_v20  ;;  %2843 = vmatprep.subr.mxu1 %v1546_v14  ;;  %v2216_v20 = vld [vmem:[%s5278_s13 + $0x20] sm:$0xff]  ;;  %v2231_v14 = vld [vmem:[%s5278_s13 + $0x98] sm:$0xff] }
 0x5e4   :  { %2809 = vmatpush3.msra.mxu0 %v1402_v26  ;;  %2844 = vmatpush3.msra.mxu1 %v1498_v47  ;;  %v2215_v26 = vld [vmem:[%s5278_s13 + $0x18] sm:$0xff]  ;;  %v2214_v47 = vld [vmem:[%s5278_s13 + $0x10] sm:$0xff] }
 0x5e5   :  { %2810 = vmatprep.subr.mxu0 %v1447_v18  ;;  %2845 = vmatprep.subr.mxu1 %v1543_v30  ;;  %v2229_v18 = vld [vmem:[%s5278_s13 + $0x88] sm:$0xff] }
 0x5e6   :  { %2811 = vmatpush3.msra.mxu0 %v1399_v60  ;;  %2846 = vmatpush3.msra.mxu1 %v1495_v32  ;;  %v2213_v30 = vld [vmem:[%s5278_s13 + $0x8] sm:$0xff]  ;;  %v2228_v60 = vld [vmem:[%s5278_s13 + $0x80] sm:$0xff] }
 0x5e7   :  { %2812 = vmatprep.subr.mxu0 %v1444_v35  ;;  %2847 = vmatprep.subr.mxu1 %v1540_v52  ;;  %v2212_v32 = vld [vmem:[%s5278_s13] sm:$0xff]  ;;  %v2247_v35 = vld [vmem:[%s5278_s13 + $0x118] sm:$0xff]  ;;  %v2246_v52 = vld [vmem:[%s5278_s13 + $0x110] sm:$0xff] }
 0x5e8   :  { %2813 = vmatpush3.msra.mxu0 %v1396_v38  ;;  %2848 = vmatpush3.msra.mxu1 %v1492_v37  ;;  %v2245_v38 = vld [vmem:[%s5278_s13 + $0x108] sm:$0xff]  ;;  %v2244_v37 = vld [vmem:[%s5278_s13 + $0x100] sm:$0xff] }
 0x5e9   :  { %2814 = vmatprep.subr.mxu0 %v1441_v39  ;;  %2849 = vmatprep.subr.mxu1 %v1537_v1  ;;  %v1628_v39 = vld [vmem:[%s5277_s12] sm:$0x7] }
 0x5ea   :  { %2815 = vmatpush3.msra.mxu0 %v1393_v12  ;;  %2850 = vmatpush3.msra.mxu1 %v1489_v28  ;;  %v1633_v12 = vrot.slane %v1628_v39, %v3726_v2  ;;  %v1637_v28 = vrot.slane %v1628_v39, %v3855_v62 }
 0x5eb   :  { %2816 = vmatprep.subr.mxu0 %v1438_v42  ;;  %2851 = vmatprep.subr.mxu1 %v1534_v29 }
 0x5ec   :  { %2817 = vmatpush3.msra.mxu0 %v1390_v43  ;;  %2852 = vmatpush3.msra.mxu1 %v1486_v34 }
 0x5ed   :  { %2064 = vmatmul.mubr.f32.vlgmr.msra.gmra.mxu0 %v4420_v23  ;;  %2134 = vmatmul.mubr.f32.vlgmr.msra.gmra.mxu1 %v4809_v41  ;;  %v2226_v23 = vld [vmem:[%s5278_s13 + $0x70] sm:$0xff]  ;;  %v1621_v41 = vld [vmem:[%s5276_s11 + $0xa48] sm:$0xff] }
 0x5ee   :  { %3124 = vmatprep.subr.mxu0 %v4613_v21  ;;  %3156 = vmatprep.mubr.msk.f32.mxu0 %vm3236_vm4, %v4613_v21 }
 0x5ef   :  { %3125 = vmatpush3.msra.mxu0 %v1627_v44  ;;  %2873 = vmatprep.subr.mxu1 %v2243_v45 }
 0x5f0   :  { %3126 = vmatprep.subr.mxu0 %v4613_v21  ;;  %2874 = vmatpush3.msra.mxu1 %v2227_v46 }
 0x5f1   :  { %3127 = vmatpush3.msra.mxu0 %v1624_v9  ;;  %2875 = vmatprep.subr.mxu1 %v2242_v48 }
 0x5f2   :  { %3128 = vmatprep.subr.mxu0 %v4613_v21  ;;  %2876 = vmatpush3.msra.mxu1 %v2226_v23 }
 0x5f3   :  { %3129 = vmatpush3.msra.mxu0 %v1621_v41  ;;  %2877 = vmatprep.subr.mxu1 %v2241_v27 }
 0x5f4   :  { %3130 = vmatprep.subr.mxu0 %v4613_v21  ;;  %2878 = vmatpush3.msra.mxu1 %v2225_v49 }
 0x5f5   :  { %3131 = vmatpush3.msra.mxu0 %v1618_v50  ;;  %2879 = vmatprep.subr.mxu1 %v2240_v51 }
 0x5f6   :  { %3132 = vmatprep.subr.mxu0 %v4613_v21  ;;  %2880 = vmatpush3.msra.mxu1 %v2224_v53 }
 0x5f7   :  { %3133 = vmatpush3.msra.mxu0 %v1615_v54  ;;  %2881 = vmatprep.subr.mxu1 %v2239_v55  ;;  %v1640_v55 = vsub.s32 2, %v3592_v25  ;;  %v2415_v25 = vld [vmem:[%s5280_s15 + $0x78] sm:$0xff] }
 0x5f8   :  { %3134 = vmatprep.subr.mxu0 %v4613_v21  ;;  %2882 = vmatpush3.msra.mxu1 %v2223_v56 }
 0x5f9   :  { %3135 = vmatpush3.msra.mxu0 %v1612_v57  ;;  %2883 = vmatprep.subr.mxu1 %v2238_v58  ;;  %v1641_v58 = vrot.slane %v1628_v39, %v1640_v55 }
 0x5fa   :  { %3136 = vmatprep.subr.mxu0 %v4613_v21  ;;  %2884 = vmatpush3.msra.mxu1 %v2222_v59 }
 0x5fb   :  { %3137 = vmatpush3.msra.mxu0 %v1609_v61  ;;  %2885 = vmatprep.subr.mxu1 %v2237_v63 }
 0x5fc   :  { %3138 = vmatprep.subr.mxu0 %v4613_v21  ;;  %2886 = vmatpush3.msra.mxu1 %v2221_v0 }
 0x5fd   :  { %3139 = vmatpush3.msra.mxu0 %v1606_v3  ;;  %2887 = vmatprep.subr.mxu1 %v2236_v4 }
 0x5fe   :  { %3140 = vmatprep.subr.mxu0 %v4613_v21  ;;  %2888 = vmatpush3.msra.mxu1 %v2220_v5 }
 0x5ff   :  { %3141 = vmatpush3.msra.mxu0 %v1603_v6  ;;  %2889 = vmatprep.subr.mxu1 %v2235_v7 }
 0x600   :  { %3142 = vmatprep.subr.mxu0 %v4613_v21  ;;  %2890 = vmatpush3.msra.mxu1 %v2219_v10 }
 0x601   :  { %3143 = vmatpush3.msra.mxu0 %v1600_v11  ;;  %2891 = vmatprep.subr.mxu1 %v2234_v13 }
 0x602   :  { %3144 = vmatprep.subr.mxu0 %v4613_v21  ;;  %2892 = vmatpush3.msra.mxu1 %v2218_v15  ;;  %v2414_v15 = vld [vmem:[%s5280_s15 + $0x70] sm:$0xff] }
 0x603   :  { %3145 = vmatpush3.msra.mxu0 %v1597_v16  ;;  %2893 = vmatprep.subr.mxu1 %v2233_v17  ;;  %v2413_v16 = vld [vmem:[%s5280_s15 + $0x68] sm:$0xff]  ;;  %v2412_v17 = vld [vmem:[%s5280_s15 + $0x60] sm:$0xff] }
 0x604   :  { %3146 = vmatprep.subr.mxu0 %v4613_v21  ;;  %2894 = vmatpush3.msra.mxu1 %v2217_v19  ;;  %v2411_v19 = vld [vmem:[%s5280_s15 + $0x58] sm:$0xff] }
 0x605   :  { %3147 = vmatpush3.msra.mxu0 %v1594_v22  ;;  %2895 = vmatprep.subr.mxu1 %v2232_v8  ;;  %v2410_v22 = vld [vmem:[%s5280_s15 + $0x50] sm:$0xff]  ;;  %v2405_v8 = vld [vmem:[%s5280_s15 + $0x28] sm:$0xff] }
 0x606   :  { %3148 = vmatprep.subr.mxu0 %v4613_v21  ;;  %2896 = vmatpush3.msra.mxu1 %v2216_v20  ;;  %v2404_v20 = vld [vmem:[%s5280_s15 + $0x20] sm:$0xff] }
 0x607   :  { %3149 = vmatpush3.msra.mxu0 %v1591_v31  ;;  %2897 = vmatprep.subr.mxu1 %v2231_v14  ;;  %v2409_v31 = vld [vmem:[%s5280_s15 + $0x48] sm:$0xff]  ;;  %v2403_v14 = vld [vmem:[%s5280_s15 + $0x18] sm:$0xff] }
 0x608   :  { %3150 = vmatprep.subr.mxu0 %v4613_v21  ;;  %2898 = vmatpush3.msra.mxu1 %v2215_v26  ;;  %v2402_v26 = vld [vmem:[%s5280_s15 + $0x10] sm:$0xff] }
 0x609   :  { %3151 = vmatpush3.msra.mxu0 %v1588_v40  ;;  %v2408_v40 = vld [vmem:[%s5280_s15 + $0x40] sm:$0xff] }
 0x60a   :  { %3152 = vmatprep.subr.mxu0 %v4613_v21 }
 0x60b   :  { %3153 = vmatpush3.msra.mxu0 %v1585_v33  ;;  %v2407_v33 = vld [vmem:[%s5280_s15 + $0x38] sm:$0xff] }
 0x60c   :  { %3154 = vmatprep.subr.mxu0 %v4613_v21 }
 0x60d   :  { %3155 = vmatpush3.msra.mxu0 %v1582_v36  ;;  %v2406_v36 = vld [vmem:[%s5280_s15 + $0x30] sm:$0xff] }
 0x60e   :  { %3157 = vmatmul.mubr.f32.vlgmr.msra.gmra.mxu0 %v4616_v24  ;;  %3159 = vmatprep.subr.mxu0 %v4613_v21  ;;  %v2230_v24 = vld [vmem:[%s5278_s13 + $0x90] sm:$0xff] }
 0x60f   :  { %3167 = vmatprep.mubr.msk.f32.mxu0 %vm3236_vm4, %v4613_v21  ;;  %2899 = vmatprep.subr.mxu1 %v2230_v24  ;;  %v2401_v24 = vld [vmem:[%s5280_s15 + $0x8] sm:$0xff] }
 0x610   :  { %2900 = vmatpush3.msra.mxu1 %v2214_v47  ;;  %3160 = vmatpush3.msra.mxu0 %v2247_v35  ;;  %v2400_v47 = vld [vmem:[%s5280_s15] sm:$0xff]  ;;  %s2501_s15 = sshll.u32 %s3237_s2, 4  ;;  %s2502_s15 = int_to_ptr.vmem [resolvable:$true] %s2501_s15 }
 0x611   :  { %2901 = vmatprep.subr.mxu1 %v2229_v18  ;;  %3161 = vmatprep.subr.mxu0 %v4613_v21  ;;  %s3213_s7 = scalar_lea.vmem %s2502_s15, 64  ;;  %p3218_p1 = scmp.lt.s32.totalorder %s2502_s15, %s2502_s15 }
 0x612   :  { %2902 = vmatpush3.msra.mxu1 %v2213_v30  ;;  %3162 = vmatpush3.msra.mxu0 %v2246_v52  ;;  %p3214_p0 = scmp.ne.s32.totalorder %s2502_s15, %s3213_s7  ;;  %p3219_p2 = scmp.lt.s32.totalorder %s3213_s7, %s3213_s7 }
 0x613   :  { %2903 = vmatprep.subr.mxu1 %v2228_v60  ;;  %3163 = vmatprep.subr.mxu0 %v4613_v21 }
 0x614   :  { %2904 = vmatpush3.msra.mxu1 %v2212_v32  ;;  %3164 = vmatpush3.msra.mxu0 %v2245_v38  ;;  %v2543_v32 = vld [vmem:[%s5279_s14] ss:$0 sm:$0xff]  ;;  %p3220_p3 = por %p3219_p2, %p3218_p1 }
 0x615   :  { %3165 = vmatprep.subr.mxu0 %v4613_v21 }
 0x616   :  { %3166 = vmatpush3.msra.mxu0 %v2244_v37  ;;  %p3221_p4 = pnand %p3220_p3, %p3214_p0 }
 0x617   :  { %3170 = vmatprep.subr.mxu0 %v4613_v21 }
 0x649   :  { %v1711_v1 = vpop.f32.mrf.mxu0  ;;  %v1782_v42 = vpop.f32.mrf.mxu1 }
 0x64a   :  { %v1712_v43 = vadd.f32 %v1711_v1, %v1633_v12 }
 0x64b   :  { %v1713_v29 = vpop.f32.mrf.mxu0  ;;  %v1784_v44 = vpop.f32.mrf.mxu1 }
 0x64c   :  { %v1714_v34 = vadd.f32 %v1713_v29, %v1637_v28  ;;  %v1783_v45 = vadd.f32 %v1782_v42, %v1712_v43 }
 0x64e   :  { %v1785_v48 = vadd.f32 %v1784_v44, %v1714_v34 }
 0x66a   :  { %v1924_v46 = vpop.f32.mrf.mxu1 }
 0x66c   :  { %v1926_v49 = vpop.f32.mrf.mxu1 }
 0x68b   :  { %v1853_v9 = vpop.f32.mrf.mxu0  ;;  %v2783_v2 = vpop.f32.mrf.mxu1 }
 0x68c   :  { %v1854_v23 = vadd.f32 %v1853_v9, %v1783_v45 }
 0x68d   :  { %v1855_v41 = vpop.f32.mrf.mxu0  ;;  %v2784_v56 = vpop.f32.mrf.mxu1 }
 0x68e   :  { %v1856_v27 = vadd.f32 %v1855_v41, %v1785_v48  ;;  %v1925_v50 = vadd.f32 %v1924_v46, %v1854_v23  ;;  %v2785_v59 = vadd.f32 %v2784_v56, %v2783_v2 }
 0x690   :  { %v1927_v51 = vadd.f32 %v1926_v49, %v1856_v27  ;;  %v2209_v54 = vmax.f32 %v1925_v50, 0.0  ;;  %v1996_v0 = vadd.f32 %v2785_v59, %v1641_v58 }
 0x692   :  { %v2210_v53 = vmax.f32 %v1927_v51, 0.0 }
 0x694   :  { %2323 = vmatprep.mubr.f32.mxu1 %v2210_v53 }
 0x695   :  { %2324 = vmatmul.mubr.f32.vlgmr.msra.gmra.mxu1 %v2209_v54 }
 0x6ad   :  { %v2818_v62 = vpop.f32.mrf.mxu0  ;;  %v2853_v61 = vpop.f32.mrf.mxu1 }
 0x6af   :  { %v2819_v57 = vpop.f32.mrf.mxu0  ;;  %v2854_v3 = vpop.f32.mrf.mxu1 }
 0x6b0   :  { %v2820_v63 = vadd.f32 %v2819_v57, %v2818_v62  ;;  %v2855_v5 = vadd.f32 %v2854_v3, %v2853_v61 }
 0x6b2   :  { %v2066_v4 = vadd.f32 %v2820_v63, %v1996_v0 }
 0x6b4   :  { %v2136_v6 = vadd.f32 %v2855_v5, %v2066_v4 }
 0x6ce   :  { %v2205_v7 = vpop.f32.mrf.mxu0 }
 0x6cf   :  { %v2206_v10 = vadd.f32 %v2205_v7, %v2136_v6 }
 0x6d0   :  { %v3158_v11 = vpop.f32.mrf.mxu0 }
 0x6d1   :  { %v2211_v13 = vmax.f32 %v2206_v10, 0.0 }
 0x6d3   :  { %3168 = vmatmul.mubr.msk.f32.vlgmr.msra.gmra.mxu0 %vm2255_vm12, %v2211_v13 }
 0x6d4   :  { %3202 = vmatprep.mubr.msk.f32.mxu0 %vm3236_vm4, %v4613_v21  ;;  %3171 = vmatpush3.msra.mxu0 %v2415_v25 }
 0x6d5   :  { %3172 = vmatprep.subr.mxu0 %v4613_v21 }
 0x6d6   :  { %3173 = vmatpush3.msra.mxu0 %v2414_v15 }
 0x6d7   :  { %3174 = vmatprep.subr.mxu0 %v4613_v21 }
 0x6d8   :  { %3175 = vmatpush3.msra.mxu0 %v2413_v16 }
 0x6d9   :  { %3176 = vmatprep.subr.mxu0 %v4613_v21 }
 0x6da   :  { %3177 = vmatpush3.msra.mxu0 %v2412_v17 }
 0x6db   :  { %3178 = vmatprep.subr.mxu0 %v4613_v21 }
 0x6dc   :  { %3179 = vmatpush3.msra.mxu0 %v2411_v19 }
 0x6dd   :  { %3180 = vmatprep.subr.mxu0 %v4613_v21 }
 0x6de   :  { %3181 = vmatpush3.msra.mxu0 %v2410_v22 }
 0x6df   :  { %3182 = vmatprep.subr.mxu0 %v4613_v21 }
 0x6e0   :  { %3183 = vmatpush3.msra.mxu0 %v2409_v31 }
 0x6e1   :  { %3184 = vmatprep.subr.mxu0 %v4613_v21 }
 0x6e2   :  { %3185 = vmatpush3.msra.mxu0 %v2408_v40 }
 0x6e3   :  { %3186 = vmatprep.subr.mxu0 %v4613_v21 }
 0x6e4   :  { %3187 = vmatpush3.msra.mxu0 %v2407_v33 }
 0x6e5   :  { %3188 = vmatprep.subr.mxu0 %v4613_v21 }
 0x6e6   :  { %3189 = vmatpush3.msra.mxu0 %v2406_v36 }
 0x6e7   :  { %3190 = vmatprep.subr.mxu0 %v4613_v21 }
 0x6e8   :  { %3191 = vmatpush3.msra.mxu0 %v2405_v8 }
 0x6e9   :  { %3192 = vmatprep.subr.mxu0 %v4613_v21 }
 0x6ea   :  { %3193 = vmatpush3.msra.mxu0 %v2404_v20 }
 0x6eb   :  { %3194 = vmatprep.subr.mxu0 %v4613_v21 }
 0x6ec   :  { %3195 = vmatpush3.msra.mxu0 %v2403_v14 }
 0x6ed   :  { %3196 = vmatprep.subr.mxu0 %v4613_v21 }
 0x6ee   :  { %3197 = vmatpush3.msra.mxu0 %v2402_v26 }
 0x6ef   :  { %3198 = vmatprep.subr.mxu0 %v4613_v21 }
 0x6f0   :  { %3199 = vmatpush3.msra.mxu0 %v2401_v24 }
 0x6f1   :  { %3200 = vmatprep.subr.mxu0 %v4613_v21  ;;  %v2545_v21 = vld [vmem:[%s5281_s16] ss:$0 sm:$0xff] }
 0x6f2   :  { %3201 = vmatpush3.msra.mxu0 %v2400_v47 }
 0x755   :  { %v2905_v18 = vpop.f32.mrf.mxu1 }
 0x757   :  { %v2906_v30 = vpop.f32.mrf.mxu1 }
 0x758   :  { %v2907_v60 = vadd.f32 %v2906_v30, %v2905_v18 }
 0x75a   :  { %v2326_v35 = vadd.f32 %v2907_v60, %v2543_v32 }
 0x793   :  { %v2395_v52 = vpop.f32.mrf.mxu0 }
 0x794   :  { %v2396_v38 = vadd.f32 %v2395_v52, %v2326_v35 }
 0x795   :  { %v3169_v37 = vpop.f32.mrf.mxu0 }
 0x796   :  { %v2399_v39 = vmax.f32 %v2396_v38, 0.0 }
 0x798   :  { %3203 = vmatmul.mubr.f32.vlgmr.msra.gmra.mxu0 %v2399_v39 }
 0x858   :  { %v2489_v1 = vpop.f32.mrf.mxu0 }
 0x859   :  { %v2490_v12 = vadd.f32 %v2545_v21, %v2489_v1 }
 0x85a   :  { %v3204_v28 = vpop.f32.mrf.mxu0 }
 0x85b   :  { %2494 = vst.msk [vmem:[#allocation4] sm:$0xf] %vm2493_vm13, %v2490_v12 }
 0x85c   :  { %3224 = shalt.err (!%p3221_p4)
}
 0x85d   :  { %2504 = dma.vmem_to_hbm [thread:$0]  %s2502_s15, 64, %s5282_s17, [#allocation5]  }
 0x85e   :  { %3233 = dma.done.wait [#allocation5], 64  }
 0x85f   :  { %3234 = vsyncadd [#allocation5], 4294967232 }
 0x860   :  { %2508 = vsyncpa [#allocation5], 1 }

</bundles_post_ra>
